<compile_context>
chip_gen: v7x
topology: tpu7x:2x2x1
jax: 0.10.0
libtpu: 0.0.40
codegen_flags: <defaults>
</compile_context>

<pallas_src>
import functools

import jax
import jax.numpy as jnp
from jax import lax
from jax.experimental import pallas as pl
from jax.experimental.pallas import tpu as pltpu


# ----------------------------------------------------------------------------
# Fused Pallas kernel (all layers + projection in one pallas_call)
# ----------------------------------------------------------------------------
def _make_fused_lstm_kernel(T, B, H, num_layers, mxu_dtype):
    """Builds the fused kernel body.

    Positional ref order:
      inputs : z_tm (T*B, Lz), cond_tm (T*B, Lc),
               layer 0: w_ih_z (Lz,4H), w_ih_c (Lc,4H), w_hh (H,4H), bias (1,4H),
               layers 1..L-1: w_ih (H,4H), w_hh (H,4H), bias (1,4H),
               w_proj (H,target), b_proj (1,target)
      outputs: out (T*B, target)
      scratch: gx_sc (T*B, 4H) f32, act_sc (T*B, H) f32
    """
    n_inputs = 2 + 4 + 3 * (num_layers - 1) + 2

    def kernel(*args):
        in_refs = args[:n_inputs]
        out_ref = args[n_inputs]
        gx_sc = args[n_inputs + 1]          # precomputed x-side gates (VMEM)
        act_sc = args[n_inputs + 2]         # inter-layer activations (VMEM)

        z_ref, c_ref = in_refs[0], in_refs[1]
        wz0, wc0, whh0, b0 = in_refs[2:6]
        p = 6
        upper_layers = []
        for _ in range(num_layers - 1):
            upper_layers.append(tuple(in_refs[p:p + 3]))   # (w_ih, w_hh, bias)
            p += 3
        wp_ref, bp_ref = in_refs[p], in_refs[p + 1]

        def mx(x):                           # cast MXU operands only
            return x.astype(mxu_dtype)

        def run_layer(gx, whh_ref):
            # gx: (T*B, 4H) f32 x-side gate pre-activations (bias included),
            # computed as one large MXU matmul — off the serial chain.
            gx_sc[...] = gx
            w_hh = mx(whh_ref[...])          # hoisted out of the time loop

            def step(r, h, c):
                # r = t*B : contiguous row block of time step t (time-major).
                g = gx_sc[pl.ds(r, B), :] + jnp.dot(
                    mx(h), w_hh, preferred_element_type=jnp.float32)
                # Gate order matches torch.nn.LSTM: i, f, g, o.
                # Element-wise gate math stays f32 (no bf16 VPU/EUP on v5e).
                i_g = jax.nn.sigmoid(g[:, 0:H])
                f_g = jax.nn.sigmoid(g[:, H:2 * H])
                g_g = jnp.tanh(g[:, 2 * H:3 * H])
                o_g = jax.nn.sigmoid(g[:, 3 * H:4 * H])
                c_new = f_g * c + i_g * g_g
                h_new = o_g * jnp.tanh(c_new)
                act_sc[pl.ds(r, B), :] = h_new
                return h_new, c_new

            h = jnp.zeros((B, H), jnp.float32)
            c = jnp.zeros((B, H), jnp.float32)
            if T <= 32:
                # Fully unrolled with static row offsets (static slices).
                for t in range(T):
                    h, c = step(t * B, h, c)
            else:
                def body(t, carry):
                    hh, cc = carry
                    r = pl.multiple_of(t * B, B)
                    return step(r, hh, cc)
                lax.fori_loop(0, T, body, (h, c), unroll=8)

        # ---- layer 0: x-side gates from z & cond (concat never materialized)
        gx0 = (jnp.dot(mx(z_ref[...]), mx(wz0[...]),
                       preferred_element_type=jnp.float32)
               + jnp.dot(mx(c_ref[...]), mx(wc0[...]),
                         preferred_element_type=jnp.float32)
               + b0[...])
        run_layer(gx0, whh0)

        # ---- layers 1..L-1: previous layer's activations are still in VMEM.
        for (wih_ref, whh_ref, b_ref) in upper_layers:
            gxl = (jnp.dot(mx(act_sc[...]), mx(wih_ref[...]),
                           preferred_element_type=jnp.float32)
                   + b_ref[...])
            run_layer(gxl, whh_ref)

        # ---- fused projection: one (T*B, H) @ (H, target) matmul.
        out_ref[...] = (jnp.dot(mx(act_sc[...]), mx(wp_ref[...]),
                                preferred_element_type=jnp.float32)
                        + bp_ref[...]).astype(out_ref.dtype)

    return kernel


# ----------------------------------------------------------------------------
# Wrapper
# ----------------------------------------------------------------------------
def lstm_generator_forward(z, cond, params, hidden_dim, *,
                           mxu_dtype=jnp.float32):
    """Pallas equivalent of _LSTMGenerator.forward (batch-first in/out)."""
    B, T, Lz = z.shape
    Lc = cond.shape[2]
    H = hidden_dim
    lstm_layers = params["lstm"]
    num_layers = len(lstm_layers)
    target_dim = params["w_proj_t"].shape[1]

    # Time-major flat layout (row = t*B + b).  Only the small D_in-sized
    # inputs get transposed; the big hidden activations never leave VMEM.
    z_tm = jnp.transpose(z, (1, 0, 2)).reshape(T * B, Lz)
    c_tm = jnp.transpose(cond, (1, 0, 2)).reshape(T * B, Lc)

    l0 = lstm_layers[0]
    inputs = [z_tm, c_tm,
              l0["w_ih_t"][:Lz],      # rows of W_ih^T that multiply z
              l0["w_ih_t"][Lz:],      # rows of W_ih^T that multiply cond
              l0["w_hh_t"], l0["bias"]]
    for layer in lstm_layers[1:]:
        inputs += [layer["w_ih_t"], layer["w_hh_t"], layer["bias"]]
    inputs += [params["w_proj_t"], params["b_proj"]]

    kernel = _make_fused_lstm_kernel(T, B, H, num_layers, mxu_dtype)

    out_tm = pl.pallas_call(
        kernel,
        out_shape=jax.ShapeDtypeStruct((T * B, target_dim), jnp.float32),
        in_specs=[pl.BlockSpec(memory_space=pltpu.MemorySpace.VMEM)] * len(inputs),
        out_specs=pl.BlockSpec(memory_space=pltpu.MemorySpace.VMEM),
        scratch_shapes=[pltpu.VMEM((T * B, 4 * H), jnp.float32),
                        pltpu.VMEM((T * B, H), jnp.float32)],
    )(*inputs)

    # time-major flat -> (B, T, target_dim); target_dim is tiny, cheap.
    return jnp.transpose(out_tm.reshape(T, B, target_dim), (1, 0, 2))


# ----------------------------------------------------------------------------
# Deterministic parameter initialization (matches the PyTorch module's shapes)
# ----------------------------------------------------------------------------
def init_params(key, latent_dim, condition_dim, hidden_dim, target_dim, num_layers):
    input_dim = latent_dim + condition_dim
    k = 1.0 / jnp.sqrt(hidden_dim)
    layers = []
    for l in range(num_layers):
        d_in = input_dim if l == 0 else hidden_dim
        key, k1, k2, k3, k4 = jax.random.split(key, 5)
        w_ih = jax.random.uniform(k1, (4 * hidden_dim, d_in), jnp.float32, -k, k)
        w_hh = jax.random.uniform(k2, (4 * hidden_dim, hidden_dim), jnp.float32, -k, k)
        b_ih = jax.random.uniform(k3, (4 * hidden_dim,), jnp.float32, -k, k)
        b_hh = jax.random.uniform(k4, (4 * hidden_dim,), jnp.float32, -k, k)
        layers.append({
            "w_ih_t": w_ih.T,                                # (d_in, 4H)
            "w_hh_t": w_hh.T,                                # (H, 4H)
            "bias": (b_ih + b_hh).reshape(1, 4 * hidden_dim),
        })
    key, k5, k6 = jax.random.split(key, 3)
    kp = 1.0 / jnp.sqrt(hidden_dim)
    w_proj = jax.random.uniform(k5, (target_dim, hidden_dim), jnp.float32, -kp, kp)
    b_proj = jax.random.uniform(k6, (target_dim,), jnp.float32, -kp, kp)
    return {"lstm": layers,
            "w_proj_t": w_proj.T,                            # (H, target_dim)
            "b_proj": b_proj.reshape(1, target_dim)}


# ----------------------------------------------------------------------------
# Pure-JAX reference (for correctness sanity check)
# ----------------------------------------------------------------------------
def reference_forward(z, cond, params, hidden_dim):
    x = jnp.concatenate([z, cond], axis=2)
    H = hidden_dim
    for layer in params["lstm"]:
        w_ih_t, w_hh_t, bias = layer["w_ih_t"], layer["w_hh_t"], layer["bias"]
        B, T, _ = x.shape

        def step(carry, x_t):
            h, c = carry
            gates = x_t @ w_ih_t + h @ w_hh_t + bias
            i = jax.nn.sigmoid(gates[:, :H])
            f = jax.nn.sigmoid(gates[:, H:2 * H])
            g = jnp.tanh(gates[:, 2 * H:3 * H])
            o = jax.nn.sigmoid(gates[:, 3 * H:])
            c = f * c + i * g
            h = o * jnp.tanh(c)
            return (h, c), h

        h0 = jnp.zeros((B, H), jnp.float32)
        c0 = jnp.zeros((B, H), jnp.float32)
        _, ys = lax.scan(step, (h0, c0), jnp.transpose(x, (1, 0, 2)))
        x = jnp.transpose(ys, (1, 0, 2))
    return x @ params["w_proj_t"] + params["b_proj"]


# ----------------------------------------------------------------------------
if __name__ == "__main__":
    latent_dim, condition_dim = 8, 4
    hidden_dim, target_dim, num_layers = 32, 3, 2
    B, T = 2, 8

    key = jax.random.PRNGKey(0)
    kz, kc, kp = jax.random.split(key, 3)
    z = jax.random.normal(kz, (B, T, latent_dim), jnp.float32)
    cond = jax.random.normal(kc, (B, T, condition_dim), jnp.float32)
    params = init_params(kp, latent_dim, condition_dim, hidden_dim,
                         target_dim, num_layers)

    ref = jax.block_until_ready(reference_forward(z, cond, params, hidden_dim))

    # f32 path: exact parity with the reference.
    fwd_f32 = jax.jit(functools.partial(lstm_generator_forward,
                                        hidden_dim=hidden_dim))
    out = jax.block_until_ready(fwd_f32(z, cond, params))
    assert out.shape == (B, T, target_dim)
    assert jnp.allclose(out, ref, atol=1e-5, rtol=1e-5), "f32 kernel mismatch"

    # bf16-MXU-input path (recommended on v6e/v7x): f32 accumulation and f32
    # cell state, so it stays close to the f32 reference.
    fwd_bf16 = jax.jit(functools.partial(lstm_generator_forward,
                                         hidden_dim=hidden_dim,
                                         mxu_dtype=jnp.bfloat16))
    out_bf16 = jax.block_until_ready(fwd_bf16(z, cond, params))
    assert out_bf16.shape == (B, T, target_dim)
    assert bool(jnp.all(jnp.isfinite(out_bf16)))
    assert jnp.allclose(out_bf16, ref, atol=2.5e-1), "bf16 kernel diverged"

    print("KERNEL_OK")
</pallas_src>

<mosaic_0001>
module attributes {stable_mosaic.version = 11 : i64} {
  func.func @kernel(%arg0: memref<16x8xf32, #tpu.memory_space<vmem>>, %arg1: memref<16x4xf32, #tpu.memory_space<vmem>>, %arg2: memref<8x128xf32, #tpu.memory_space<vmem>>, %arg3: memref<4x128xf32, #tpu.memory_space<vmem>>, %arg4: memref<32x128xf32, #tpu.memory_space<vmem>>, %arg5: memref<1x128xf32, #tpu.memory_space<vmem>>, %arg6: memref<32x128xf32, #tpu.memory_space<vmem>>, %arg7: memref<32x128xf32, #tpu.memory_space<vmem>>, %arg8: memref<1x128xf32, #tpu.memory_space<vmem>>, %arg9: memref<32x3xf32, #tpu.memory_space<vmem>>, %arg10: memref<1x3xf32, #tpu.memory_space<vmem>>, %arg11: memref<16x3xf32, #tpu.memory_space<vmem>>, %arg12: memref<16x128xf32, #tpu.memory_space<vmem>>, %arg13: memref<16x32xf32, #tpu.memory_space<vmem>>) attributes {dimension_semantics = [], scalar_prefetch = 0 : i64, scratch_operands = 2 : i64, tpu.core_type = #tpu.core_type<tc>} {
    %c0 = arith.constant 0 : index
    %c0_0 = arith.constant 0 : index
    %0 = vector.load %arg0[%c0, %c0_0] : memref<16x8xf32, #tpu.memory_space<vmem>>, vector<16x8xf32>
    %c0_1 = arith.constant 0 : index
    %c0_2 = arith.constant 0 : index
    %1 = vector.load %arg2[%c0_1, %c0_2] : memref<8x128xf32, #tpu.memory_space<vmem>>, vector<8x128xf32>
    %cst = arith.constant dense<0.000000e+00> : vector<16x128xf32>
    %2 = tpu.matmul %0, %1, %cst {dimension_numbers = #tpu.dot_dimension_numbers<[1], [0], [0], [1], [0, 0, 1, 1], [], []>} : vector<16x8xf32>, vector<8x128xf32>, vector<16x128xf32> -> vector<16x128xf32>
    %c0_3 = arith.constant 0 : index
    %c0_4 = arith.constant 0 : index
    %3 = vector.load %arg1[%c0_3, %c0_4] : memref<16x4xf32, #tpu.memory_space<vmem>>, vector<16x4xf32>
    %c0_5 = arith.constant 0 : index
    %c0_6 = arith.constant 0 : index
    %4 = vector.load %arg3[%c0_5, %c0_6] : memref<4x128xf32, #tpu.memory_space<vmem>>, vector<4x128xf32>
    %cst_7 = arith.constant dense<0.000000e+00> : vector<16x128xf32>
    %5 = tpu.matmul %3, %4, %cst_7 {dimension_numbers = #tpu.dot_dimension_numbers<[1], [0], [0], [1], [0, 0, 1, 1], [], []>} : vector<16x4xf32>, vector<4x128xf32>, vector<16x128xf32> -> vector<16x128xf32>
    %6 = arith.addf %2, %5 : vector<16x128xf32>
    %c0_8 = arith.constant 0 : index
    %c0_9 = arith.constant 0 : index
    %7 = vector.load %arg5[%c0_8, %c0_9] : memref<1x128xf32, #tpu.memory_space<vmem>>, vector<1x128xf32>
    %8 = vector.broadcast %7 : vector<1x128xf32> to vector<16x128xf32>
    %9 = arith.addf %6, %8 : vector<16x128xf32>
    %c0_10 = arith.constant 0 : index
    %c0_11 = arith.constant 0 : index
    %10 = vector.load %arg12[%c0_10, %c0_11] : memref<16x128xf32, #tpu.memory_space<vmem>>, vector<16x128xf32>
    tpu.vector_store %arg12[%c0_10, %c0_11], %9 {strides = array<i32>} : memref<16x128xf32, #tpu.memory_space<vmem>>, vector<16x128xf32>,
    %c0_12 = arith.constant 0 : index
    %c0_13 = arith.constant 0 : index
    %11 = vector.load %arg4[%c0_12, %c0_13] : memref<32x128xf32, #tpu.memory_space<vmem>>, vector<32x128xf32>
    %cst_14 = arith.constant 0.000000e+00 : f32
    %12 = vector.broadcast %cst_14 : f32 to vector<2x32xf32>
    %cst_15 = arith.constant 0.000000e+00 : f32
    %13 = vector.broadcast %cst_15 : f32 to vector<2x32xf32>
    %c0_16 = arith.constant 0 : index
    %c0_17 = arith.constant 0 : index
    %14 = vector.load %arg12[%c0_16, %c0_17] : memref<16x128xf32, #tpu.memory_space<vmem>>, vector<2x128xf32>
    %cst_18 = arith.constant dense<0.000000e+00> : vector<2x128xf32>
    %15 = tpu.matmul %12, %11, %cst_18 {dimension_numbers = #tpu.dot_dimension_numbers<[1], [0], [0], [1], [0, 0, 1, 1], [], []>} : vector<2x32xf32>, vector<32x128xf32>, vector<2x128xf32> -> vector<2x128xf32>
    %16 = arith.addf %14, %15 : vector<2x128xf32>
    %17 = vector.extract_strided_slice %16 {offsets = [0, 0], sizes = [2, 32], strides = [1, 1]} : vector<2x128xf32> to vector<2x32xf32>
    %18 = arith.negf %17 : vector<2x32xf32>
    %19 = math.exp %18 : vector<2x32xf32>
    %cst_19 = arith.constant 1.000000e+00 : f32
    %20 = vector.broadcast %cst_19 : f32 to vector<2x32xf32>
    %21 = arith.addf %20, %19 : vector<2x32xf32>
    %22 = arith.divf %20, %21 : vector<2x32xf32>
    %23 = vector.extract_strided_slice %16 {offsets = [0, 32], sizes = [2, 32], strides = [1, 1]} : vector<2x128xf32> to vector<2x32xf32>
    %24 = arith.negf %23 : vector<2x32xf32>
    %25 = math.exp %24 : vector<2x32xf32>
    %cst_20 = arith.constant 1.000000e+00 : f32
    %26 = vector.broadcast %cst_20 : f32 to vector<2x32xf32>
    %27 = arith.addf %26, %25 : vector<2x32xf32>
    %28 = arith.divf %26, %27 : vector<2x32xf32>
    %29 = vector.extract_strided_slice %16 {offsets = [0, 64], sizes = [2, 32], strides = [1, 1]} : vector<2x128xf32> to vector<2x32xf32>
    %30 = math.tanh %29 : vector<2x32xf32>
    %31 = vector.extract_strided_slice %16 {offsets = [0, 96], sizes = [2, 32], strides = [1, 1]} : vector<2x128xf32> to vector<2x32xf32>
    %32 = arith.negf %31 : vector<2x32xf32>
    %33 = math.exp %32 : vector<2x32xf32>
    %cst_21 = arith.constant 1.000000e+00 : f32
    %34 = vector.broadcast %cst_21 : f32 to vector<2x32xf32>
    %35 = arith.addf %34, %33 : vector<2x32xf32>
    %36 = arith.divf %34, %35 : vector<2x32xf32>
    %37 = arith.mulf %28, %13 : vector<2x32xf32>
    %38 = arith.mulf %22, %30 : vector<2x32xf32>
    %39 = arith.addf %37, %38 : vector<2x32xf32>
    %40 = math.tanh %39 : vector<2x32xf32>
    %41 = arith.mulf %36, %40 : vector<2x32xf32>
    %c0_22 = arith.constant 0 : index
    %c0_23 = arith.constant 0 : index
    %42 = vector.load %arg13[%c0_22, %c0_23] : memref<16x32xf32, #tpu.memory_space<vmem>>, vector<2x32xf32>
    tpu.vector_store %arg13[%c0_22, %c0_23], %41 {strides = array<i32>} : memref<16x32xf32, #tpu.memory_space<vmem>>, vector<2x32xf32>,
    %c2 = arith.constant 2 : index
    %c0_24 = arith.constant 0 : index
    %43 = vector.load %arg12[%c2, %c0_24] : memref<16x128xf32, #tpu.memory_space<vmem>>, vector<2x128xf32>
    %cst_25 = arith.constant dense<0.000000e+00> : vector<2x128xf32>
    %44 = tpu.matmul %41, %11, %cst_25 {dimension_numbers = #tpu.dot_dimension_numbers<[1], [0], [0], [1], [0, 0, 1, 1], [], []>} : vector<2x32xf32>, vector<32x128xf32>, vector<2x128xf32> -> vector<2x128xf32>
    %45 = arith.addf %43, %44 : vector<2x128xf32>
    %46 = vector.extract_strided_slice %45 {offsets = [0, 0], sizes = [2, 32], strides = [1, 1]} : vector<2x128xf32> to vector<2x32xf32>
    %47 = arith.negf %46 : vector<2x32xf32>
    %48 = math.exp %47 : vector<2x32xf32>
    %cst_26 = arith.constant 1.000000e+00 : f32
    %49 = vector.broadcast %cst_26 : f32 to vector<2x32xf32>
    %50 = arith.addf %49, %48 : vector<2x32xf32>
    %51 = arith.divf %49, %50 : vector<2x32xf32>
    %52 = vector.extract_strided_slice %45 {offsets = [0, 32], sizes = [2, 32], strides = [1, 1]} : vector<2x128xf32> to vector<2x32xf32>
    %53 = arith.negf %52 : vector<2x32xf32>
    %54 = math.exp %53 : vector<2x32xf32>
    %cst_27 = arith.constant 1.000000e+00 : f32
    %55 = vector.broadcast %cst_27 : f32 to vector<2x32xf32>
    %56 = arith.addf %55, %54 : vector<2x32xf32>
    %57 = arith.divf %55, %56 : vector<2x32xf32>
    %58 = vector.extract_strided_slice %45 {offsets = [0, 64], sizes = [2, 32], strides = [1, 1]} : vector<2x128xf32> to vector<2x32xf32>
    %59 = math.tanh %58 : vector<2x32xf32>
    %60 = vector.extract_strided_slice %45 {offsets = [0, 96], sizes = [2, 32], strides = [1, 1]} : vector<2x128xf32> to vector<2x32xf32>
    %61 = arith.negf %60 : vector<2x32xf32>
    %62 = math.exp %61 : vector<2x32xf32>
    %cst_28 = arith.constant 1.000000e+00 : f32
    %63 = vector.broadcast %cst_28 : f32 to vector<2x32xf32>
    %64 = arith.addf %63, %62 : vector<2x32xf32>
    %65 = arith.divf %63, %64 : vector<2x32xf32>
    %66 = arith.mulf %57, %39 : vector<2x32xf32>
    %67 = arith.mulf %51, %59 : vector<2x32xf32>
    %68 = arith.addf %66, %67 : vector<2x32xf32>
    %69 = math.tanh %68 : vector<2x32xf32>
    %70 = arith.mulf %65, %69 : vector<2x32xf32>
    %c2_29 = arith.constant 2 : index
    %c0_30 = arith.constant 0 : index
    %71 = vector.load %arg13[%c2_29, %c0_30] : memref<16x32xf32, #tpu.memory_space<vmem>>, vector<2x32xf32>
    tpu.vector_store %arg13[%c2_29, %c0_30], %70 {strides = array<i32>} : memref<16x32xf32, #tpu.memory_space<vmem>>, vector<2x32xf32>,
    %c4 = arith.constant 4 : index
    %c0_31 = arith.constant 0 : index
    %72 = vector.load %arg12[%c4, %c0_31] : memref<16x128xf32, #tpu.memory_space<vmem>>, vector<2x128xf32>
    %cst_32 = arith.constant dense<0.000000e+00> : vector<2x128xf32>
    %73 = tpu.matmul %70, %11, %cst_32 {dimension_numbers = #tpu.dot_dimension_numbers<[1], [0], [0], [1], [0, 0, 1, 1], [], []>} : vector<2x32xf32>, vector<32x128xf32>, vector<2x128xf32> -> vector<2x128xf32>
    %74 = arith.addf %72, %73 : vector<2x128xf32>
    %75 = vector.extract_strided_slice %74 {offsets = [0, 0], sizes = [2, 32], strides = [1, 1]} : vector<2x128xf32> to vector<2x32xf32>
    %76 = arith.negf %75 : vector<2x32xf32>
    %77 = math.exp %76 : vector<2x32xf32>
    %cst_33 = arith.constant 1.000000e+00 : f32
    %78 = vector.broadcast %cst_33 : f32 to vector<2x32xf32>
    %79 = arith.addf %78, %77 : vector<2x32xf32>
    %80 = arith.divf %78, %79 : vector<2x32xf32>
    %81 = vector.extract_strided_slice %74 {offsets = [0, 32], sizes = [2, 32], strides = [1, 1]} : vector<2x128xf32> to vector<2x32xf32>
    %82 = arith.negf %81 : vector<2x32xf32>
    %83 = math.exp %82 : vector<2x32xf32>
    %cst_34 = arith.constant 1.000000e+00 : f32
    %84 = vector.broadcast %cst_34 : f32 to vector<2x32xf32>
    %85 = arith.addf %84, %83 : vector<2x32xf32>
    %86 = arith.divf %84, %85 : vector<2x32xf32>
    %87 = vector.extract_strided_slice %74 {offsets = [0, 64], sizes = [2, 32], strides = [1, 1]} : vector<2x128xf32> to vector<2x32xf32>
    %88 = math.tanh %87 : vector<2x32xf32>
    %89 = vector.extract_strided_slice %74 {offsets = [0, 96], sizes = [2, 32], strides = [1, 1]} : vector<2x128xf32> to vector<2x32xf32>
    %90 = arith.negf %89 : vector<2x32xf32>
    %91 = math.exp %90 : vector<2x32xf32>
    %cst_35 = arith.constant 1.000000e+00 : f32
    %92 = vector.broadcast %cst_35 : f32 to vector<2x32xf32>
    %93 = arith.addf %92, %91 : vector<2x32xf32>
    %94 = arith.divf %92, %93 : vector<2x32xf32>
    %95 = arith.mulf %86, %68 : vector<2x32xf32>
    %96 = arith.mulf %80, %88 : vector<2x32xf32>
    %97 = arith.addf %95, %96 : vector<2x32xf32>
    %98 = math.tanh %97 : vector<2x32xf32>
    %99 = arith.mulf %94, %98 : vector<2x32xf32>
    %c4_36 = arith.constant 4 : index
    %c0_37 = arith.constant 0 : index
    %100 = vector.load %arg13[%c4_36, %c0_37] : memref<16x32xf32, #tpu.memory_space<vmem>>, vector<2x32xf32>
    tpu.vector_store %arg13[%c4_36, %c0_37], %99 {strides = array<i32>} : memref<16x32xf32, #tpu.memory_space<vmem>>, vector<2x32xf32>,
    %c6 = arith.constant 6 : index
    %c0_38 = arith.constant 0 : index
    %101 = vector.load %arg12[%c6, %c0_38] : memref<16x128xf32, #tpu.memory_space<vmem>>, vector<2x128xf32>
    %cst_39 = arith.constant dense<0.000000e+00> : vector<2x128xf32>
    %102 = tpu.matmul %99, %11, %cst_39 {dimension_numbers = #tpu.dot_dimension_numbers<[1], [0], [0], [1], [0, 0, 1, 1], [], []>} : vector<2x32xf32>, vector<32x128xf32>, vector<2x128xf32> -> vector<2x128xf32>
    %103 = arith.addf %101, %102 : vector<2x128xf32>
    %104 = vector.extract_strided_slice %103 {offsets = [0, 0], sizes = [2, 32], strides = [1, 1]} : vector<2x128xf32> to vector<2x32xf32>
    %105 = arith.negf %104 : vector<2x32xf32>
    %106 = math.exp %105 : vector<2x32xf32>
    %cst_40 = arith.constant 1.000000e+00 : f32
    %107 = vector.broadcast %cst_40 : f32 to vector<2x32xf32>
    %108 = arith.addf %107, %106 : vector<2x32xf32>
    %109 = arith.divf %107, %108 : vector<2x32xf32>
    %110 = vector.extract_strided_slice %103 {offsets = [0, 32], sizes = [2, 32], strides = [1, 1]} : vector<2x128xf32> to vector<2x32xf32>
    %111 = arith.negf %110 : vector<2x32xf32>
    %112 = math.exp %111 : vector<2x32xf32>
    %cst_41 = arith.constant 1.000000e+00 : f32
    %113 = vector.broadcast %cst_41 : f32 to vector<2x32xf32>
    %114 = arith.addf %113, %112 : vector<2x32xf32>
    %115 = arith.divf %113, %114 : vector<2x32xf32>
    %116 = vector.extract_strided_slice %103 {offsets = [0, 64], sizes = [2, 32], strides = [1, 1]} : vector<2x128xf32> to vector<2x32xf32>
    %117 = math.tanh %116 : vector<2x32xf32>
    %118 = vector.extract_strided_slice %103 {offsets = [0, 96], sizes = [2, 32], strides = [1, 1]} : vector<2x128xf32> to vector<2x32xf32>
    %119 = arith.negf %118 : vector<2x32xf32>
    %120 = math.exp %119 : vector<2x32xf32>
    %cst_42 = arith.constant 1.000000e+00 : f32
    %121 = vector.broadcast %cst_42 : f32 to vector<2x32xf32>
    %122 = arith.addf %121, %120 : vector<2x32xf32>
    %123 = arith.divf %121, %122 : vector<2x32xf32>
    %124 = arith.mulf %115, %97 : vector<2x32xf32>
    %125 = arith.mulf %109, %117 : vector<2x32xf32>
    %126 = arith.addf %124, %125 : vector<2x32xf32>
    %127 = math.tanh %126 : vector<2x32xf32>
    %128 = arith.mulf %123, %127 : vector<2x32xf32>
    %c6_43 = arith.constant 6 : index
    %c0_44 = arith.constant 0 : index
    %129 = vector.load %arg13[%c6_43, %c0_44] : memref<16x32xf32, #tpu.memory_space<vmem>>, vector<2x32xf32>
    tpu.vector_store %arg13[%c6_43, %c0_44], %128 {strides = array<i32>} : memref<16x32xf32, #tpu.memory_space<vmem>>, vector<2x32xf32>,
    %c8 = arith.constant 8 : index
    %c0_45 = arith.constant 0 : index
    %130 = vector.load %arg12[%c8, %c0_45] : memref<16x128xf32, #tpu.memory_space<vmem>>, vector<2x128xf32>
    %cst_46 = arith.constant dense<0.000000e+00> : vector<2x128xf32>
    %131 = tpu.matmul %128, %11, %cst_46 {dimension_numbers = #tpu.dot_dimension_numbers<[1], [0], [0], [1], [0, 0, 1, 1], [], []>} : vector<2x32xf32>, vector<32x128xf32>, vector<2x128xf32> -> vector<2x128xf32>
    %132 = arith.addf %130, %131 : vector<2x128xf32>
    %133 = vector.extract_strided_slice %132 {offsets = [0, 0], sizes = [2, 32], strides = [1, 1]} : vector<2x128xf32> to vector<2x32xf32>
    %134 = arith.negf %133 : vector<2x32xf32>
    %135 = math.exp %134 : vector<2x32xf32>
    %cst_47 = arith.constant 1.000000e+00 : f32
    %136 = vector.broadcast %cst_47 : f32 to vector<2x32xf32>
    %137 = arith.addf %136, %135 : vector<2x32xf32>
    %138 = arith.divf %136, %137 : vector<2x32xf32>
    %139 = vector.extract_strided_slice %132 {offsets = [0, 32], sizes = [2, 32], strides = [1, 1]} : vector<2x128xf32> to vector<2x32xf32>
    %140 = arith.negf %139 : vector<2x32xf32>
    %141 = math.exp %140 : vector<2x32xf32>
    %cst_48 = arith.constant 1.000000e+00 : f32
    %142 = vector.broadcast %cst_48 : f32 to vector<2x32xf32>
    %143 = arith.addf %142, %141 : vector<2x32xf32>
    %144 = arith.divf %142, %143 : vector<2x32xf32>
    %145 = vector.extract_strided_slice %132 {offsets = [0, 64], sizes = [2, 32], strides = [1, 1]} : vector<2x128xf32> to vector<2x32xf32>
    %146 = math.tanh %145 : vector<2x32xf32>
    %147 = vector.extract_strided_slice %132 {offsets = [0, 96], sizes = [2, 32], strides = [1, 1]} : vector<2x128xf32> to vector<2x32xf32>
    %148 = arith.negf %147 : vector<2x32xf32>
    %149 = math.exp %148 : vector<2x32xf32>
    %cst_49 = arith.constant 1.000000e+00 : f32
    %150 = vector.broadcast %cst_49 : f32 to vector<2x32xf32>
    %151 = arith.addf %150, %149 : vector<2x32xf32>
    %152 = arith.divf %150, %151 : vector<2x32xf32>
    %153 = arith.mulf %144, %126 : vector<2x32xf32>
    %154 = arith.mulf %138, %146 : vector<2x32xf32>
    %155 = arith.addf %153, %154 : vector<2x32xf32>
    %156 = math.tanh %155 : vector<2x32xf32>
    %157 = arith.mulf %152, %156 : vector<2x32xf32>
    %c8_50 = arith.constant 8 : index
    %c0_51 = arith.constant 0 : index
    %158 = vector.load %arg13[%c8_50, %c0_51] : memref<16x32xf32, #tpu.memory_space<vmem>>, vector<2x32xf32>
    tpu.vector_store %arg13[%c8_50, %c0_51], %157 {strides = array<i32>} : memref<16x32xf32, #tpu.memory_space<vmem>>, vector<2x32xf32>,
    %c10 = arith.constant 10 : index
    %c0_52 = arith.constant 0 : index
    %159 = vector.load %arg12[%c10, %c0_52] : memref<16x128xf32, #tpu.memory_space<vmem>>, vector<2x128xf32>
    %cst_53 = arith.constant dense<0.000000e+00> : vector<2x128xf32>
    %160 = tpu.matmul %157, %11, %cst_53 {dimension_numbers = #tpu.dot_dimension_numbers<[1], [0], [0], [1], [0, 0, 1, 1], [], []>} : vector<2x32xf32>, vector<32x128xf32>, vector<2x128xf32> -> vector<2x128xf32>
    %161 = arith.addf %159, %160 : vector<2x128xf32>
    %162 = vector.extract_strided_slice %161 {offsets = [0, 0], sizes = [2, 32], strides = [1, 1]} : vector<2x128xf32> to vector<2x32xf32>
    %163 = arith.negf %162 : vector<2x32xf32>
    %164 = math.exp %163 : vector<2x32xf32>
    %cst_54 = arith.constant 1.000000e+00 : f32
    %165 = vector.broadcast %cst_54 : f32 to vector<2x32xf32>
    %166 = arith.addf %165, %164 : vector<2x32xf32>
    %167 = arith.divf %165, %166 : vector<2x32xf32>
    %168 = vector.extract_strided_slice %161 {offsets = [0, 32], sizes = [2, 32], strides = [1, 1]} : vector<2x128xf32> to vector<2x32xf32>
    %169 = arith.negf %168 : vector<2x32xf32>
    %170 = math.exp %169 : vector<2x32xf32>
    %cst_55 = arith.constant 1.000000e+00 : f32
    %171 = vector.broadcast %cst_55 : f32 to vector<2x32xf32>
    %172 = arith.addf %171, %170 : vector<2x32xf32>
    %173 = arith.divf %171, %172 : vector<2x32xf32>
    %174 = vector.extract_strided_slice %161 {offsets = [0, 64], sizes = [2, 32], strides = [1, 1]} : vector<2x128xf32> to vector<2x32xf32>
    %175 = math.tanh %174 : vector<2x32xf32>
    %176 = vector.extract_strided_slice %161 {offsets = [0, 96], sizes = [2, 32], strides = [1, 1]} : vector<2x128xf32> to vector<2x32xf32>
    %177 = arith.negf %176 : vector<2x32xf32>
    %178 = math.exp %177 : vector<2x32xf32>
    %cst_56 = arith.constant 1.000000e+00 : f32
    %179 = vector.broadcast %cst_56 : f32 to vector<2x32xf32>
    %180 = arith.addf %179, %178 : vector<2x32xf32>
    %181 = arith.divf %179, %180 : vector<2x32xf32>
    %182 = arith.mulf %173, %155 : vector<2x32xf32>
    %183 = arith.mulf %167, %175 : vector<2x32xf32>
    %184 = arith.addf %182, %183 : vector<2x32xf32>
    %185 = math.tanh %184 : vector<2x32xf32>
    %186 = arith.mulf %181, %185 : vector<2x32xf32>
    %c10_57 = arith.constant 10 : index
    %c0_58 = arith.constant 0 : index
    %187 = vector.load %arg13[%c10_57, %c0_58] : memref<16x32xf32, #tpu.memory_space<vmem>>, vector<2x32xf32>
    tpu.vector_store %arg13[%c10_57, %c0_58], %186 {strides = array<i32>} : memref<16x32xf32, #tpu.memory_space<vmem>>, vector<2x32xf32>,
    %c12 = arith.constant 12 : index
    %c0_59 = arith.constant 0 : index
    %188 = vector.load %arg12[%c12, %c0_59] : memref<16x128xf32, #tpu.memory_space<vmem>>, vector<2x128xf32>
    %cst_60 = arith.constant dense<0.000000e+00> : vector<2x128xf32>
    %189 = tpu.matmul %186, %11, %cst_60 {dimension_numbers = #tpu.dot_dimension_numbers<[1], [0], [0], [1], [0, 0, 1, 1], [], []>} : vector<2x32xf32>, vector<32x128xf32>, vector<2x128xf32> -> vector<2x128xf32>
    %190 = arith.addf %188, %189 : vector<2x128xf32>
    %191 = vector.extract_strided_slice %190 {offsets = [0, 0], sizes = [2, 32], strides = [1, 1]} : vector<2x128xf32> to vector<2x32xf32>
    %192 = arith.negf %191 : vector<2x32xf32>
    %193 = math.exp %192 : vector<2x32xf32>
    %cst_61 = arith.constant 1.000000e+00 : f32
    %194 = vector.broadcast %cst_61 : f32 to vector<2x32xf32>
    %195 = arith.addf %194, %193 : vector<2x32xf32>
    %196 = arith.divf %194, %195 : vector<2x32xf32>
    %197 = vector.extract_strided_slice %190 {offsets = [0, 32], sizes = [2, 32], strides = [1, 1]} : vector<2x128xf32> to vector<2x32xf32>
    %198 = arith.negf %197 : vector<2x32xf32>
    %199 = math.exp %198 : vector<2x32xf32>
    %cst_62 = arith.constant 1.000000e+00 : f32
    %200 = vector.broadcast %cst_62 : f32 to vector<2x32xf32>
    %201 = arith.addf %200, %199 : vector<2x32xf32>
    %202 = arith.divf %200, %201 : vector<2x32xf32>
    %203 = vector.extract_strided_slice %190 {offsets = [0, 64], sizes = [2, 32], strides = [1, 1]} : vector<2x128xf32> to vector<2x32xf32>
    %204 = math.tanh %203 : vector<2x32xf32>
    %205 = vector.extract_strided_slice %190 {offsets = [0, 96], sizes = [2, 32], strides = [1, 1]} : vector<2x128xf32> to vector<2x32xf32>
    %206 = arith.negf %205 : vector<2x32xf32>
    %207 = math.exp %206 : vector<2x32xf32>
    %cst_63 = arith.constant 1.000000e+00 : f32
    %208 = vector.broadcast %cst_63 : f32 to vector<2x32xf32>
    %209 = arith.addf %208, %207 : vector<2x32xf32>
    %210 = arith.divf %208, %209 : vector<2x32xf32>
    %211 = arith.mulf %202, %184 : vector<2x32xf32>
    %212 = arith.mulf %196, %204 : vector<2x32xf32>
    %213 = arith.addf %211, %212 : vector<2x32xf32>
    %214 = math.tanh %213 : vector<2x32xf32>
    %215 = arith.mulf %210, %214 : vector<2x32xf32>
    %c12_64 = arith.constant 12 : index
    %c0_65 = arith.constant 0 : index
    %216 = vector.load %arg13[%c12_64, %c0_65] : memref<16x32xf32, #tpu.memory_space<vmem>>, vector<2x32xf32>
    tpu.vector_store %arg13[%c12_64, %c0_65], %215 {strides = array<i32>} : memref<16x32xf32, #tpu.memory_space<vmem>>, vector<2x32xf32>,
    %c14 = arith.constant 14 : index
    %c0_66 = arith.constant 0 : index
    %217 = vector.load %arg12[%c14, %c0_66] : memref<16x128xf32, #tpu.memory_space<vmem>>, vector<2x128xf32>
    %cst_67 = arith.constant dense<0.000000e+00> : vector<2x128xf32>
    %218 = tpu.matmul %215, %11, %cst_67 {dimension_numbers = #tpu.dot_dimension_numbers<[1], [0], [0], [1], [0, 0, 1, 1], [], []>} : vector<2x32xf32>, vector<32x128xf32>, vector<2x128xf32> -> vector<2x128xf32>
    %219 = arith.addf %217, %218 : vector<2x128xf32>
    %220 = vector.extract_strided_slice %219 {offsets = [0, 0], sizes = [2, 32], strides = [1, 1]} : vector<2x128xf32> to vector<2x32xf32>
    %221 = arith.negf %220 : vector<2x32xf32>
    %222 = math.exp %221 : vector<2x32xf32>
    %cst_68 = arith.constant 1.000000e+00 : f32
    %223 = vector.broadcast %cst_68 : f32 to vector<2x32xf32>
    %224 = arith.addf %223, %222 : vector<2x32xf32>
    %225 = arith.divf %223, %224 : vector<2x32xf32>
    %226 = vector.extract_strided_slice %219 {offsets = [0, 32], sizes = [2, 32], strides = [1, 1]} : vector<2x128xf32> to vector<2x32xf32>
    %227 = arith.negf %226 : vector<2x32xf32>
    %228 = math.exp %227 : vector<2x32xf32>
    %cst_69 = arith.constant 1.000000e+00 : f32
    %229 = vector.broadcast %cst_69 : f32 to vector<2x32xf32>
    %230 = arith.addf %229, %228 : vector<2x32xf32>
    %231 = arith.divf %229, %230 : vector<2x32xf32>
    %232 = vector.extract_strided_slice %219 {offsets = [0, 64], sizes = [2, 32], strides = [1, 1]} : vector<2x128xf32> to vector<2x32xf32>
    %233 = math.tanh %232 : vector<2x32xf32>
    %234 = vector.extract_strided_slice %219 {offsets = [0, 96], sizes = [2, 32], strides = [1, 1]} : vector<2x128xf32> to vector<2x32xf32>
    %235 = arith.negf %234 : vector<2x32xf32>
    %236 = math.exp %235 : vector<2x32xf32>
    %cst_70 = arith.constant 1.000000e+00 : f32
    %237 = vector.broadcast %cst_70 : f32 to vector<2x32xf32>
    %238 = arith.addf %237, %236 : vector<2x32xf32>
    %239 = arith.divf %237, %238 : vector<2x32xf32>
    %240 = arith.mulf %231, %213 : vector<2x32xf32>
    %241 = arith.mulf %225, %233 : vector<2x32xf32>
    %242 = arith.addf %240, %241 : vector<2x32xf32>
    %243 = math.tanh %242 : vector<2x32xf32>
    %244 = arith.mulf %239, %243 : vector<2x32xf32>
    %c14_71 = arith.constant 14 : index
    %c0_72 = arith.constant 0 : index
    %245 = vector.load %arg13[%c14_71, %c0_72] : memref<16x32xf32, #tpu.memory_space<vmem>>, vector<2x32xf32>
    tpu.vector_store %arg13[%c14_71, %c0_72], %244 {strides = array<i32>} : memref<16x32xf32, #tpu.memory_space<vmem>>, vector<2x32xf32>,
    %c0_73 = arith.constant 0 : index
    %c0_74 = arith.constant 0 : index
    %246 = vector.load %arg13[%c0_73, %c0_74] : memref<16x32xf32, #tpu.memory_space<vmem>>, vector<16x32xf32>
    %c0_75 = arith.constant 0 : index
    %c0_76 = arith.constant 0 : index
    %247 = vector.load %arg6[%c0_75, %c0_76] : memref<32x128xf32, #tpu.memory_space<vmem>>, vector<32x128xf32>
    %cst_77 = arith.constant dense<0.000000e+00> : vector<16x128xf32>
    %248 = tpu.matmul %246, %247, %cst_77 {dimension_numbers = #tpu.dot_dimension_numbers<[1], [0], [0], [1], [0, 0, 1, 1], [], []>} : vector<16x32xf32>, vector<32x128xf32>, vector<16x128xf32> -> vector<16x128xf32>
    %c0_78 = arith.constant 0 : index
    %c0_79 = arith.constant 0 : index
    %249 = vector.load %arg8[%c0_78, %c0_79] : memref<1x128xf32, #tpu.memory_space<vmem>>, vector<1x128xf32>
    %250 = vector.broadcast %249 : vector<1x128xf32> to vector<16x128xf32>
    %251 = arith.addf %248, %250 : vector<16x128xf32>
    %c0_80 = arith.constant 0 : index
    %c0_81 = arith.constant 0 : index
    %252 = vector.load %arg12[%c0_80, %c0_81] : memref<16x128xf32, #tpu.memory_space<vmem>>, vector<16x128xf32>
    tpu.vector_store %arg12[%c0_80, %c0_81], %251 {strides = array<i32>} : memref<16x128xf32, #tpu.memory_space<vmem>>, vector<16x128xf32>,
    %c0_82 = arith.constant 0 : index
    %c0_83 = arith.constant 0 : index
    %253 = vector.load %arg7[%c0_82, %c0_83] : memref<32x128xf32, #tpu.memory_space<vmem>>, vector<32x128xf32>
    %cst_84 = arith.constant 0.000000e+00 : f32
    %254 = vector.broadcast %cst_84 : f32 to vector<2x32xf32>
    %cst_85 = arith.constant 0.000000e+00 : f32
    %255 = vector.broadcast %cst_85 : f32 to vector<2x32xf32>
    %c0_86 = arith.constant 0 : index
    %c0_87 = arith.constant 0 : index
    %256 = vector.load %arg12[%c0_86, %c0_87] : memref<16x128xf32, #tpu.memory_space<vmem>>, vector<2x128xf32>
    %cst_88 = arith.constant dense<0.000000e+00> : vector<2x128xf32>
    %257 = tpu.matmul %254, %253, %cst_88 {dimension_numbers = #tpu.dot_dimension_numbers<[1], [0], [0], [1], [0, 0, 1, 1], [], []>} : vector<2x32xf32>, vector<32x128xf32>, vector<2x128xf32> -> vector<2x128xf32>
    %258 = arith.addf %256, %257 : vector<2x128xf32>
    %259 = vector.extract_strided_slice %258 {offsets = [0, 0], sizes = [2, 32], strides = [1, 1]} : vector<2x128xf32> to vector<2x32xf32>
    %260 = arith.negf %259 : vector<2x32xf32>
    %261 = math.exp %260 : vector<2x32xf32>
    %cst_89 = arith.constant 1.000000e+00 : f32
    %262 = vector.broadcast %cst_89 : f32 to vector<2x32xf32>
    %263 = arith.addf %262, %261 : vector<2x32xf32>
    %264 = arith.divf %262, %263 : vector<2x32xf32>
    %265 = vector.extract_strided_slice %258 {offsets = [0, 32], sizes = [2, 32], strides = [1, 1]} : vector<2x128xf32> to vector<2x32xf32>
    %266 = arith.negf %265 : vector<2x32xf32>
    %267 = math.exp %266 : vector<2x32xf32>
    %cst_90 = arith.constant 1.000000e+00 : f32
    %268 = vector.broadcast %cst_90 : f32 to vector<2x32xf32>
    %269 = arith.addf %268, %267 : vector<2x32xf32>
    %270 = arith.divf %268, %269 : vector<2x32xf32>
    %271 = vector.extract_strided_slice %258 {offsets = [0, 64], sizes = [2, 32], strides = [1, 1]} : vector<2x128xf32> to vector<2x32xf32>
    %272 = math.tanh %271 : vector<2x32xf32>
    %273 = vector.extract_strided_slice %258 {offsets = [0, 96], sizes = [2, 32], strides = [1, 1]} : vector<2x128xf32> to vector<2x32xf32>
    %274 = arith.negf %273 : vector<2x32xf32>
    %275 = math.exp %274 : vector<2x32xf32>
    %cst_91 = arith.constant 1.000000e+00 : f32
    %276 = vector.broadcast %cst_91 : f32 to vector<2x32xf32>
    %277 = arith.addf %276, %275 : vector<2x32xf32>
    %278 = arith.divf %276, %277 : vector<2x32xf32>
    %279 = arith.mulf %270, %255 : vector<2x32xf32>
    %280 = arith.mulf %264, %272 : vector<2x32xf32>
    %281 = arith.addf %279, %280 : vector<2x32xf32>
    %282 = math.tanh %281 : vector<2x32xf32>
    %283 = arith.mulf %278, %282 : vector<2x32xf32>
    %c0_92 = arith.constant 0 : index
    %c0_93 = arith.constant 0 : index
    %284 = vector.load %arg13[%c0_92, %c0_93] : memref<16x32xf32, #tpu.memory_space<vmem>>, vector<2x32xf32>
    tpu.vector_store %arg13[%c0_92, %c0_93], %283 {strides = array<i32>} : memref<16x32xf32, #tpu.memory_space<vmem>>, vector<2x32xf32>,
    %c2_94 = arith.constant 2 : index
    %c0_95 = arith.constant 0 : index
    %285 = vector.load %arg12[%c2_94, %c0_95] : memref<16x128xf32, #tpu.memory_space<vmem>>, vector<2x128xf32>
    %cst_96 = arith.constant dense<0.000000e+00> : vector<2x128xf32>
    %286 = tpu.matmul %283, %253, %cst_96 {dimension_numbers = #tpu.dot_dimension_numbers<[1], [0], [0], [1], [0, 0, 1, 1], [], []>} : vector<2x32xf32>, vector<32x128xf32>, vector<2x128xf32> -> vector<2x128xf32>
    %287 = arith.addf %285, %286 : vector<2x128xf32>
    %288 = vector.extract_strided_slice %287 {offsets = [0, 0], sizes = [2, 32], strides = [1, 1]} : vector<2x128xf32> to vector<2x32xf32>
    %289 = arith.negf %288 : vector<2x32xf32>
    %290 = math.exp %289 : vector<2x32xf32>
    %cst_97 = arith.constant 1.000000e+00 : f32
    %291 = vector.broadcast %cst_97 : f32 to vector<2x32xf32>
    %292 = arith.addf %291, %290 : vector<2x32xf32>
    %293 = arith.divf %291, %292 : vector<2x32xf32>
    %294 = vector.extract_strided_slice %287 {offsets = [0, 32], sizes = [2, 32], strides = [1, 1]} : vector<2x128xf32> to vector<2x32xf32>
    %295 = arith.negf %294 : vector<2x32xf32>
    %296 = math.exp %295 : vector<2x32xf32>
    %cst_98 = arith.constant 1.000000e+00 : f32
    %297 = vector.broadcast %cst_98 : f32 to vector<2x32xf32>
    %298 = arith.addf %297, %296 : vector<2x32xf32>
    %299 = arith.divf %297, %298 : vector<2x32xf32>
    %300 = vector.extract_strided_slice %287 {offsets = [0, 64], sizes = [2, 32], strides = [1, 1]} : vector<2x128xf32> to vector<2x32xf32>
    %301 = math.tanh %300 : vector<2x32xf32>
    %302 = vector.extract_strided_slice %287 {offsets = [0, 96], sizes = [2, 32], strides = [1, 1]} : vector<2x128xf32> to vector<2x32xf32>
    %303 = arith.negf %302 : vector<2x32xf32>
    %304 = math.exp %303 : vector<2x32xf32>
    %cst_99 = arith.constant 1.000000e+00 : f32
    %305 = vector.broadcast %cst_99 : f32 to vector<2x32xf32>
    %306 = arith.addf %305, %304 : vector<2x32xf32>
    %307 = arith.divf %305, %306 : vector<2x32xf32>
    %308 = arith.mulf %299, %281 : vector<2x32xf32>
    %309 = arith.mulf %293, %301 : vector<2x32xf32>
    %310 = arith.addf %308, %309 : vector<2x32xf32>
    %311 = math.tanh %310 : vector<2x32xf32>
    %312 = arith.mulf %307, %311 : vector<2x32xf32>
    %c2_100 = arith.constant 2 : index
    %c0_101 = arith.constant 0 : index
    %313 = vector.load %arg13[%c2_100, %c0_101] : memref<16x32xf32, #tpu.memory_space<vmem>>, vector<2x32xf32>
    tpu.vector_store %arg13[%c2_100, %c0_101], %312 {strides = array<i32>} : memref<16x32xf32, #tpu.memory_space<vmem>>, vector<2x32xf32>,
    %c4_102 = arith.constant 4 : index
    %c0_103 = arith.constant 0 : index
    %314 = vector.load %arg12[%c4_102, %c0_103] : memref<16x128xf32, #tpu.memory_space<vmem>>, vector<2x128xf32>
    %cst_104 = arith.constant dense<0.000000e+00> : vector<2x128xf32>
    %315 = tpu.matmul %312, %253, %cst_104 {dimension_numbers = #tpu.dot_dimension_numbers<[1], [0], [0], [1], [0, 0, 1, 1], [], []>} : vector<2x32xf32>, vector<32x128xf32>, vector<2x128xf32> -> vector<2x128xf32>
    %316 = arith.addf %314, %315 : vector<2x128xf32>
    %317 = vector.extract_strided_slice %316 {offsets = [0, 0], sizes = [2, 32], strides = [1, 1]} : vector<2x128xf32> to vector<2x32xf32>
    %318 = arith.negf %317 : vector<2x32xf32>
    %319 = math.exp %318 : vector<2x32xf32>
    %cst_105 = arith.constant 1.000000e+00 : f32
    %320 = vector.broadcast %cst_105 : f32 to vector<2x32xf32>
    %321 = arith.addf %320, %319 : vector<2x32xf32>
    %322 = arith.divf %320, %321 : vector<2x32xf32>
    %323 = vector.extract_strided_slice %316 {offsets = [0, 32], sizes = [2, 32], strides = [1, 1]} : vector<2x128xf32> to vector<2x32xf32>
    %324 = arith.negf %323 : vector<2x32xf32>
    %325 = math.exp %324 : vector<2x32xf32>
    %cst_106 = arith.constant 1.000000e+00 : f32
    %326 = vector.broadcast %cst_106 : f32 to vector<2x32xf32>
    %327 = arith.addf %326, %325 : vector<2x32xf32>
    %328 = arith.divf %326, %327 : vector<2x32xf32>
    %329 = vector.extract_strided_slice %316 {offsets = [0, 64], sizes = [2, 32], strides = [1, 1]} : vector<2x128xf32> to vector<2x32xf32>
    %330 = math.tanh %329 : vector<2x32xf32>
    %331 = vector.extract_strided_slice %316 {offsets = [0, 96], sizes = [2, 32], strides = [1, 1]} : vector<2x128xf32> to vector<2x32xf32>
    %332 = arith.negf %331 : vector<2x32xf32>
    %333 = math.exp %332 : vector<2x32xf32>
    %cst_107 = arith.constant 1.000000e+00 : f32
    %334 = vector.broadcast %cst_107 : f32 to vector<2x32xf32>
    %335 = arith.addf %334, %333 : vector<2x32xf32>
    %336 = arith.divf %334, %335 : vector<2x32xf32>
    %337 = arith.mulf %328, %310 : vector<2x32xf32>
    %338 = arith.mulf %322, %330 : vector<2x32xf32>
    %339 = arith.addf %337, %338 : vector<2x32xf32>
    %340 = math.tanh %339 : vector<2x32xf32>
    %341 = arith.mulf %336, %340 : vector<2x32xf32>
    %c4_108 = arith.constant 4 : index
    %c0_109 = arith.constant 0 : index
    %342 = vector.load %arg13[%c4_108, %c0_109] : memref<16x32xf32, #tpu.memory_space<vmem>>, vector<2x32xf32>
    tpu.vector_store %arg13[%c4_108, %c0_109], %341 {strides = array<i32>} : memref<16x32xf32, #tpu.memory_space<vmem>>, vector<2x32xf32>,
    %c6_110 = arith.constant 6 : index
    %c0_111 = arith.constant 0 : index
    %343 = vector.load %arg12[%c6_110, %c0_111] : memref<16x128xf32, #tpu.memory_space<vmem>>, vector<2x128xf32>
    %cst_112 = arith.constant dense<0.000000e+00> : vector<2x128xf32>
    %344 = tpu.matmul %341, %253, %cst_112 {dimension_numbers = #tpu.dot_dimension_numbers<[1], [0], [0], [1], [0, 0, 1, 1], [], []>} : vector<2x32xf32>, vector<32x128xf32>, vector<2x128xf32> -> vector<2x128xf32>
    %345 = arith.addf %343, %344 : vector<2x128xf32>
    %346 = vector.extract_strided_slice %345 {offsets = [0, 0], sizes = [2, 32], strides = [1, 1]} : vector<2x128xf32> to vector<2x32xf32>
    %347 = arith.negf %346 : vector<2x32xf32>
    %348 = math.exp %347 : vector<2x32xf32>
    %cst_113 = arith.constant 1.000000e+00 : f32
    %349 = vector.broadcast %cst_113 : f32 to vector<2x32xf32>
    %350 = arith.addf %349, %348 : vector<2x32xf32>
    %351 = arith.divf %349, %350 : vector<2x32xf32>
    %352 = vector.extract_strided_slice %345 {offsets = [0, 32], sizes = [2, 32], strides = [1, 1]} : vector<2x128xf32> to vector<2x32xf32>
    %353 = arith.negf %352 : vector<2x32xf32>
    %354 = math.exp %353 : vector<2x32xf32>
    %cst_114 = arith.constant 1.000000e+00 : f32
    %355 = vector.broadcast %cst_114 : f32 to vector<2x32xf32>
    %356 = arith.addf %355, %354 : vector<2x32xf32>
    %357 = arith.divf %355, %356 : vector<2x32xf32>
    %358 = vector.extract_strided_slice %345 {offsets = [0, 64], sizes = [2, 32], strides = [1, 1]} : vector<2x128xf32> to vector<2x32xf32>
    %359 = math.tanh %358 : vector<2x32xf32>
    %360 = vector.extract_strided_slice %345 {offsets = [0, 96], sizes = [2, 32], strides = [1, 1]} : vector<2x128xf32> to vector<2x32xf32>
    %361 = arith.negf %360 : vector<2x32xf32>
    %362 = math.exp %361 : vector<2x32xf32>
    %cst_115 = arith.constant 1.000000e+00 : f32
    %363 = vector.broadcast %cst_115 : f32 to vector<2x32xf32>
    %364 = arith.addf %363, %362 : vector<2x32xf32>
    %365 = arith.divf %363, %364 : vector<2x32xf32>
    %366 = arith.mulf %357, %339 : vector<2x32xf32>
    %367 = arith.mulf %351, %359 : vector<2x32xf32>
    %368 = arith.addf %366, %367 : vector<2x32xf32>
    %369 = math.tanh %368 : vector<2x32xf32>
    %370 = arith.mulf %365, %369 : vector<2x32xf32>
    %c6_116 = arith.constant 6 : index
    %c0_117 = arith.constant 0 : index
    %371 = vector.load %arg13[%c6_116, %c0_117] : memref<16x32xf32, #tpu.memory_space<vmem>>, vector<2x32xf32>
    tpu.vector_store %arg13[%c6_116, %c0_117], %370 {strides = array<i32>} : memref<16x32xf32, #tpu.memory_space<vmem>>, vector<2x32xf32>,
    %c8_118 = arith.constant 8 : index
    %c0_119 = arith.constant 0 : index
    %372 = vector.load %arg12[%c8_118, %c0_119] : memref<16x128xf32, #tpu.memory_space<vmem>>, vector<2x128xf32>
    %cst_120 = arith.constant dense<0.000000e+00> : vector<2x128xf32>
    %373 = tpu.matmul %370, %253, %cst_120 {dimension_numbers = #tpu.dot_dimension_numbers<[1], [0], [0], [1], [0, 0, 1, 1], [], []>} : vector<2x32xf32>, vector<32x128xf32>, vector<2x128xf32> -> vector<2x128xf32>
    %374 = arith.addf %372, %373 : vector<2x128xf32>
    %375 = vector.extract_strided_slice %374 {offsets = [0, 0], sizes = [2, 32], strides = [1, 1]} : vector<2x128xf32> to vector<2x32xf32>
    %376 = arith.negf %375 : vector<2x32xf32>
    %377 = math.exp %376 : vector<2x32xf32>
    %cst_121 = arith.constant 1.000000e+00 : f32
    %378 = vector.broadcast %cst_121 : f32 to vector<2x32xf32>
    %379 = arith.addf %378, %377 : vector<2x32xf32>
    %380 = arith.divf %378, %379 : vector<2x32xf32>
    %381 = vector.extract_strided_slice %374 {offsets = [0, 32], sizes = [2, 32], strides = [1, 1]} : vector<2x128xf32> to vector<2x32xf32>
    %382 = arith.negf %381 : vector<2x32xf32>
    %383 = math.exp %382 : vector<2x32xf32>
    %cst_122 = arith.constant 1.000000e+00 : f32
    %384 = vector.broadcast %cst_122 : f32 to vector<2x32xf32>
    %385 = arith.addf %384, %383 : vector<2x32xf32>
    %386 = arith.divf %384, %385 : vector<2x32xf32>
    %387 = vector.extract_strided_slice %374 {offsets = [0, 64], sizes = [2, 32], strides = [1, 1]} : vector<2x128xf32> to vector<2x32xf32>
    %388 = math.tanh %387 : vector<2x32xf32>
    %389 = vector.extract_strided_slice %374 {offsets = [0, 96], sizes = [2, 32], strides = [1, 1]} : vector<2x128xf32> to vector<2x32xf32>
    %390 = arith.negf %389 : vector<2x32xf32>
    %391 = math.exp %390 : vector<2x32xf32>
    %cst_123 = arith.constant 1.000000e+00 : f32
    %392 = vector.broadcast %cst_123 : f32 to vector<2x32xf32>
    %393 = arith.addf %392, %391 : vector<2x32xf32>
    %394 = arith.divf %392, %393 : vector<2x32xf32>
    %395 = arith.mulf %386, %368 : vector<2x32xf32>
    %396 = arith.mulf %380, %388 : vector<2x32xf32>
    %397 = arith.addf %395, %396 : vector<2x32xf32>
    %398 = math.tanh %397 : vector<2x32xf32>
    %399 = arith.mulf %394, %398 : vector<2x32xf32>
    %c8_124 = arith.constant 8 : index
    %c0_125 = arith.constant 0 : index
    %400 = vector.load %arg13[%c8_124, %c0_125] : memref<16x32xf32, #tpu.memory_space<vmem>>, vector<2x32xf32>
    tpu.vector_store %arg13[%c8_124, %c0_125], %399 {strides = array<i32>} : memref<16x32xf32, #tpu.memory_space<vmem>>, vector<2x32xf32>,
    %c10_126 = arith.constant 10 : index
    %c0_127 = arith.constant 0 : index
    %401 = vector.load %arg12[%c10_126, %c0_127] : memref<16x128xf32, #tpu.memory_space<vmem>>, vector<2x128xf32>
    %cst_128 = arith.constant dense<0.000000e+00> : vector<2x128xf32>
    %402 = tpu.matmul %399, %253, %cst_128 {dimension_numbers = #tpu.dot_dimension_numbers<[1], [0], [0], [1], [0, 0, 1, 1], [], []>} : vector<2x32xf32>, vector<32x128xf32>, vector<2x128xf32> -> vector<2x128xf32>
    %403 = arith.addf %401, %402 : vector<2x128xf32>
    %404 = vector.extract_strided_slice %403 {offsets = [0, 0], sizes = [2, 32], strides = [1, 1]} : vector<2x128xf32> to vector<2x32xf32>
    %405 = arith.negf %404 : vector<2x32xf32>
    %406 = math.exp %405 : vector<2x32xf32>
    %cst_129 = arith.constant 1.000000e+00 : f32
    %407 = vector.broadcast %cst_129 : f32 to vector<2x32xf32>
    %408 = arith.addf %407, %406 : vector<2x32xf32>
    %409 = arith.divf %407, %408 : vector<2x32xf32>
    %410 = vector.extract_strided_slice %403 {offsets = [0, 32], sizes = [2, 32], strides = [1, 1]} : vector<2x128xf32> to vector<2x32xf32>
    %411 = arith.negf %410 : vector<2x32xf32>
    %412 = math.exp %411 : vector<2x32xf32>
    %cst_130 = arith.constant 1.000000e+00 : f32
    %413 = vector.broadcast %cst_130 : f32 to vector<2x32xf32>
    %414 = arith.addf %413, %412 : vector<2x32xf32>
    %415 = arith.divf %413, %414 : vector<2x32xf32>
    %416 = vector.extract_strided_slice %403 {offsets = [0, 64], sizes = [2, 32], strides = [1, 1]} : vector<2x128xf32> to vector<2x32xf32>
    %417 = math.tanh %416 : vector<2x32xf32>
    %418 = vector.extract_strided_slice %403 {offsets = [0, 96], sizes = [2, 32], strides = [1, 1]} : vector<2x128xf32> to vector<2x32xf32>
    %419 = arith.negf %418 : vector<2x32xf32>
    %420 = math.exp %419 : vector<2x32xf32>
    %cst_131 = arith.constant 1.000000e+00 : f32
    %421 = vector.broadcast %cst_131 : f32 to vector<2x32xf32>
    %422 = arith.addf %421, %420 : vector<2x32xf32>
    %423 = arith.divf %421, %422 : vector<2x32xf32>
    %424 = arith.mulf %415, %397 : vector<2x32xf32>
    %425 = arith.mulf %409, %417 : vector<2x32xf32>
    %426 = arith.addf %424, %425 : vector<2x32xf32>
    %427 = math.tanh %426 : vector<2x32xf32>
    %428 = arith.mulf %423, %427 : vector<2x32xf32>
    %c10_132 = arith.constant 10 : index
    %c0_133 = arith.constant 0 : index
    %429 = vector.load %arg13[%c10_132, %c0_133] : memref<16x32xf32, #tpu.memory_space<vmem>>, vector<2x32xf32>
    tpu.vector_store %arg13[%c10_132, %c0_133], %428 {strides = array<i32>} : memref<16x32xf32, #tpu.memory_space<vmem>>, vector<2x32xf32>,
    %c12_134 = arith.constant 12 : index
    %c0_135 = arith.constant 0 : index
    %430 = vector.load %arg12[%c12_134, %c0_135] : memref<16x128xf32, #tpu.memory_space<vmem>>, vector<2x128xf32>
    %cst_136 = arith.constant dense<0.000000e+00> : vector<2x128xf32>
    %431 = tpu.matmul %428, %253, %cst_136 {dimension_numbers = #tpu.dot_dimension_numbers<[1], [0], [0], [1], [0, 0, 1, 1], [], []>} : vector<2x32xf32>, vector<32x128xf32>, vector<2x128xf32> -> vector<2x128xf32>
    %432 = arith.addf %430, %431 : vector<2x128xf32>
    %433 = vector.extract_strided_slice %432 {offsets = [0, 0], sizes = [2, 32], strides = [1, 1]} : vector<2x128xf32> to vector<2x32xf32>
    %434 = arith.negf %433 : vector<2x32xf32>
    %435 = math.exp %434 : vector<2x32xf32>
    %cst_137 = arith.constant 1.000000e+00 : f32
    %436 = vector.broadcast %cst_137 : f32 to vector<2x32xf32>
    %437 = arith.addf %436, %435 : vector<2x32xf32>
    %438 = arith.divf %436, %437 : vector<2x32xf32>
    %439 = vector.extract_strided_slice %432 {offsets = [0, 32], sizes = [2, 32], strides = [1, 1]} : vector<2x128xf32> to vector<2x32xf32>
    %440 = arith.negf %439 : vector<2x32xf32>
    %441 = math.exp %440 : vector<2x32xf32>
    %cst_138 = arith.constant 1.000000e+00 : f32
    %442 = vector.broadcast %cst_138 : f32 to vector<2x32xf32>
    %443 = arith.addf %442, %441 : vector<2x32xf32>
    %444 = arith.divf %442, %443 : vector<2x32xf32>
    %445 = vector.extract_strided_slice %432 {offsets = [0, 64], sizes = [2, 32], strides = [1, 1]} : vector<2x128xf32> to vector<2x32xf32>
    %446 = math.tanh %445 : vector<2x32xf32>
    %447 = vector.extract_strided_slice %432 {offsets = [0, 96], sizes = [2, 32], strides = [1, 1]} : vector<2x128xf32> to vector<2x32xf32>
    %448 = arith.negf %447 : vector<2x32xf32>
    %449 = math.exp %448 : vector<2x32xf32>
    %cst_139 = arith.constant 1.000000e+00 : f32
    %450 = vector.broadcast %cst_139 : f32 to vector<2x32xf32>
    %451 = arith.addf %450, %449 : vector<2x32xf32>
    %452 = arith.divf %450, %451 : vector<2x32xf32>
    %453 = arith.mulf %444, %426 : vector<2x32xf32>
    %454 = arith.mulf %438, %446 : vector<2x32xf32>
    %455 = arith.addf %453, %454 : vector<2x32xf32>
    %456 = math.tanh %455 : vector<2x32xf32>
    %457 = arith.mulf %452, %456 : vector<2x32xf32>
    %c12_140 = arith.constant 12 : index
    %c0_141 = arith.constant 0 : index
    %458 = vector.load %arg13[%c12_140, %c0_141] : memref<16x32xf32, #tpu.memory_space<vmem>>, vector<2x32xf32>
    tpu.vector_store %arg13[%c12_140, %c0_141], %457 {strides = array<i32>} : memref<16x32xf32, #tpu.memory_space<vmem>>, vector<2x32xf32>,
    %c14_142 = arith.constant 14 : index
    %c0_143 = arith.constant 0 : index
    %459 = vector.load %arg12[%c14_142, %c0_143] : memref<16x128xf32, #tpu.memory_space<vmem>>, vector<2x128xf32>
    %cst_144 = arith.constant dense<0.000000e+00> : vector<2x128xf32>
    %460 = tpu.matmul %457, %253, %cst_144 {dimension_numbers = #tpu.dot_dimension_numbers<[1], [0], [0], [1], [0, 0, 1, 1], [], []>} : vector<2x32xf32>, vector<32x128xf32>, vector<2x128xf32> -> vector<2x128xf32>
    %461 = arith.addf %459, %460 : vector<2x128xf32>
    %462 = vector.extract_strided_slice %461 {offsets = [0, 0], sizes = [2, 32], strides = [1, 1]} : vector<2x128xf32> to vector<2x32xf32>
    %463 = arith.negf %462 : vector<2x32xf32>
    %464 = math.exp %463 : vector<2x32xf32>
    %cst_145 = arith.constant 1.000000e+00 : f32
    %465 = vector.broadcast %cst_145 : f32 to vector<2x32xf32>
    %466 = arith.addf %465, %464 : vector<2x32xf32>
    %467 = arith.divf %465, %466 : vector<2x32xf32>
    %468 = vector.extract_strided_slice %461 {offsets = [0, 32], sizes = [2, 32], strides = [1, 1]} : vector<2x128xf32> to vector<2x32xf32>
    %469 = arith.negf %468 : vector<2x32xf32>
    %470 = math.exp %469 : vector<2x32xf32>
    %cst_146 = arith.constant 1.000000e+00 : f32
    %471 = vector.broadcast %cst_146 : f32 to vector<2x32xf32>
    %472 = arith.addf %471, %470 : vector<2x32xf32>
    %473 = arith.divf %471, %472 : vector<2x32xf32>
    %474 = vector.extract_strided_slice %461 {offsets = [0, 64], sizes = [2, 32], strides = [1, 1]} : vector<2x128xf32> to vector<2x32xf32>
    %475 = math.tanh %474 : vector<2x32xf32>
    %476 = vector.extract_strided_slice %461 {offsets = [0, 96], sizes = [2, 32], strides = [1, 1]} : vector<2x128xf32> to vector<2x32xf32>
    %477 = arith.negf %476 : vector<2x32xf32>
    %478 = math.exp %477 : vector<2x32xf32>
    %cst_147 = arith.constant 1.000000e+00 : f32
    %479 = vector.broadcast %cst_147 : f32 to vector<2x32xf32>
    %480 = arith.addf %479, %478 : vector<2x32xf32>
    %481 = arith.divf %479, %480 : vector<2x32xf32>
    %482 = arith.mulf %473, %455 : vector<2x32xf32>
    %483 = arith.mulf %467, %475 : vector<2x32xf32>
    %484 = arith.addf %482, %483 : vector<2x32xf32>
    %485 = math.tanh %484 : vector<2x32xf32>
    %486 = arith.mulf %481, %485 : vector<2x32xf32>
    %c14_148 = arith.constant 14 : index
    %c0_149 = arith.constant 0 : index
    %487 = vector.load %arg13[%c14_148, %c0_149] : memref<16x32xf32, #tpu.memory_space<vmem>>, vector<2x32xf32>
    tpu.vector_store %arg13[%c14_148, %c0_149], %486 {strides = array<i32>} : memref<16x32xf32, #tpu.memory_space<vmem>>, vector<2x32xf32>,
    %c0_150 = arith.constant 0 : index
    %c0_151 = arith.constant 0 : index
    %488 = vector.load %arg13[%c0_150, %c0_151] : memref<16x32xf32, #tpu.memory_space<vmem>>, vector<16x32xf32>
    %c0_152 = arith.constant 0 : index
    %c0_153 = arith.constant 0 : index
    %489 = vector.load %arg9[%c0_152, %c0_153] : memref<32x3xf32, #tpu.memory_space<vmem>>, vector<32x3xf32>
    %cst_154 = arith.constant dense<0.000000e+00> : vector<16x3xf32>
    %490 = tpu.matmul %488, %489, %cst_154 {dimension_numbers = #tpu.dot_dimension_numbers<[1], [0], [0], [1], [0, 0, 1, 1], [], []>} : vector<16x32xf32>, vector<32x3xf32>, vector<16x3xf32> -> vector<16x3xf32>
    %c0_155 = arith.constant 0 : index
    %c0_156 = arith.constant 0 : index
    %491 = vector.load %arg10[%c0_155, %c0_156] : memref<1x3xf32, #tpu.memory_space<vmem>>, vector<1x3xf32>
    %492 = vector.broadcast %491 : vector<1x3xf32> to vector<16x3xf32>
    %493 = arith.addf %490, %492 : vector<16x3xf32>
    %c0_157 = arith.constant 0 : index
    %c0_158 = arith.constant 0 : index
    %494 = vector.load %arg11[%c0_157, %c0_158] : memref<16x3xf32, #tpu.memory_space<vmem>>, vector<16x3xf32>
    tpu.vector_store %arg11[%c0_157, %c0_158], %493 {strides = array<i32>} : memref<16x3xf32, #tpu.memory_space<vmem>>, vector<16x3xf32>,
    return
  }
}

</mosaic_0001>

<bundles_post_ra>
// kernel: lstm_generator_forward.1
= control target key start
LH: loop header
LB: loop body
LE: loop exit
PB: predicated region body
PF: predicated region fallthrough
CT: control target
= control target key end

     0   :  { %16 = vsyncpa [#allocation5], 0  ;;  %s2710_s17 = smov [#allocation4]   ;;  %s3074_s0 = inlined_call_operand.vmem [shape: f32[16,8], index: 0, kind: input, shape index: {}]   ;;  %s3075_s1 = inlined_call_operand.vmem [shape: f32[16,4], index: 1, kind: input, shape index: {}]   ;;  %s3076_s2 = inlined_call_operand.vmem [shape: f32[8,128], index: 2, kind: input, shape index: {}]   ;;  %s3077_s3 = inlined_call_operand.vmem [shape: f32[4,128], index: 3, kind: input, shape index: {}]   ;;  %s3078_s4 = inlined_call_operand.vmem [shape: f32[32,128], index: 4, kind: input, shape index: {}]   ;;  %s3079_s5 = inlined_call_operand.vmem [shape: f32[1,128], index: 5, kind: input, shape index: {}]   ;;  %s3080_s6 = inlined_call_operand.vmem [shape: f32[32,128], index: 6, kind: input, shape index: {}]   ;;  %s3081_s7 = inlined_call_operand.vmem [shape: f32[32,128], index: 7, kind: input, shape index: {}]   ;;  %s3082_s8 = inlined_call_operand.vmem [shape: f32[1,128], index: 8, kind: input, shape index: {}]   ;;  %s3083_s9 = inlined_call_operand.vmem [shape: f32[32,3], index: 9, kind: input, shape index: {}]   ;;  %s3084_s10 = inlined_call_operand.hbm [shape: f32[1,3], index: 10, kind: input, shape index: {}]   ;;  %s3085_s11 = inlined_call_operand.vmem [shape: f32[16,3], index: 11, kind: output, shape index: {}]  }
   0x1   :  { %s43_s18 = sshll.u32 %s2710_s17, 4  ;;  %s2686_s21 = scalar_lea.hbm %s3084_s10, 16  ;;  %s44_s18 = int_to_ptr.vmem [resolvable:$true] %s43_s18 }
   0x2   :  { %p2687_p0 = scmp.ne.s32.totalorder %s3084_s10, %s2686_s21  ;;  %p2690_p1 = scmp.lt.u32.totalorder %s2686_s21, %s3084_s10 }
   0x4   :  { %p2692_p2 = pnand %p2690_p1, %p2687_p0 }
   0x6   :  { %2695 = shalt.err (!%p2692_p2)
}
   0x7   :  { %s2696_s26 = scalar_lea.vmem %s44_s18, 16  ;;  %s2700_s27 = scalar_lea.vmem %s44_s18, 32 }
   0x8   :  { %p2697_p3 = scmp.ne.s32.totalorder %s44_s18, %s2696_s26  ;;  %p2701_p4 = scmp.lt.s32.totalorder %s44_s18, %s44_s18 }
   0x9   :  { %p2702_p5 = scmp.lt.s32.totalorder %s2700_s27, %s2696_s26 }
   0xb   :  { %p2703_p6 = por %p2702_p5, %p2701_p4 }
   0xd   :  { %p2704_p7 = pnand %p2703_p6, %p2697_p3 }
   0xf   :  { %2707 = shalt.err (!%p2704_p7)
}
  0x10   :  { %46 = dma.hbm_to_vmem [thread:$0]  %s3084_s10, 16, %s44_s18, [#allocation5]  }
  0x11   :  { %2708 = dma.done.wait [#allocation5], 16  }
  0x12   :  { %2709 = vsyncadd [#allocation5], 4294967280  ;;  %vm63_vm0 = vcmask 1043456   ;;  %vm56_vm1 = vcmask 31744   ;;  %v55_v0 = vld [vmem:[%s3077_s3] sm:$0xf] }
  0x13   :  { %v52_v1 = vld [vmem:[%s3076_s2] sm:$0xff]  ;;  %vm142_vm2 = vcmask 64512   ;;  %2230 = vmatprep.subr.msk.mxu1 %vm63_vm0, %v55_v0  ;;  %v54_v4 = vld [vmem:[%s3075_s1 + $0x8] sm:$0xff]  ;;  %v237_v9 = vld [vmem:[%s3078_s4 + $0x10] sm:$0xff]  ;;  %v2711_v11 = vmov 0.0|0.0   ;;  %vm2712_vm3 = vmmov 0  }
  0x14   :  { %v53_v2 = vld [vmem:[%s3075_s1] sm:$0xff]  ;;  %2235 = vmatprep.subr.mxu0 %v52_v1  ;;  %v51_v5 = vld [vmem:[%s3074_s0 + $0x8] sm:$0xff]  ;;  %2231 = vmatpush3.msk.msra.mxu1 %vm63_vm0, %v55_v0  ;;  %v238_v10 = vld [vmem:[%s3078_s4 + $0x18] sm:$0xff]  ;;  %v2713_v12 = vmov 0.0   ;;  %s2714_s27 = smov 64   ;;  %vm343_vm4 = vcmask 254976  }
  0x15   :  { %v50_v3 = vld [vmem:[%s3074_s0] sm:$0xff]  ;;  %2232 = vmatprep.mubr.msk.f32.mxu1 %vm56_vm1, %v53_v2  ;;  %v236_v7 = vld [vmem:[%s3078_s4 + $0x8] sm:$0xff]  ;;  %2236 = vmatpush3.msra.mxu0 %v52_v1  ;;  %v2828_v13 = vpack.c.bf16 %v238_v10, %v237_v9  ;;  %vm240_vm5 = vcmask 261120   ;;  %vm2082_vm6 = vcmask 23552  }
  0x16   :  { %v235_v6 = vld [vmem:[%s3078_s4] sm:$0xff]  ;;  %2237 = vmatprep.mubr.msk.f32.mxu0 %vm142_vm2, %v50_v3  ;;  %2233 = vmatmul.mubr.msk.f32.vlgmr.msra.gmra.mrb[0].mxu1 %vm56_vm1, %v54_v4 }
  0x17   :  { %v2814_v8 = vpack.c.bf16 %v236_v7, %v235_v6  ;;  %2238 = vmatmul.mubr.msk.f32.vlgmr.msra.gmra.mrb[0].mxu0 %vm142_vm2, %v51_v5  ;;  %2438 = vmatprep.subr.bf16.mxu1 %v2711_v11  ;;  %v2095_v16 = vld [vmem:[%s3079_s5] ss:$0 sm:$0xff]  ;;  %s2715_s5 = smov 32  }
  0x18   :  { %2248 = vmatprep.mubr.msk.f32.mxu1 %vm2712_vm3, %v2713_v12  ;;  %2444 = vmatprep.subr.bf16.mxu0 %v2711_v11 }
  0x19   :  { %2440 = vmatpush3.bf16.msra.mxu1 %v2814_v8  ;;  %2446 = vmatpush3.bf16.msra.mxu0 %v2814_v8 }
  0x1a   :  { %2441 = vmatprep.subr.bf16.mxu1 %v2711_v11  ;;  %2447 = vmatprep.subr.bf16.mxu0 %v2711_v11 }
  0x1b   :  { %2259 = vmatprep.mubr.msk.f32.mxu0 %vm2712_vm3, %v2713_v12 }
  0x1d   :  { %2443 = vmatpush3.bf16.msra.mxu1 %v2828_v13  ;;  %2449 = vmatpush3.bf16.msra.mxu0 %v2828_v13 }
  0x1e   :  { %2450 = vmatprep.subr.bf16.mxu1 %v2711_v11  ;;  %2456 = vmatprep.subr.bf16.mxu0 %v2711_v11 }
  0x20   :  { %2249 = vmatmul.mubr.f32.vlgmr.msra.gmra.mrb[2].mxu1 %v2713_v12 }
  0x21   :  { %2452 = vmatpush3.bf16.msra.mxu1 %v2814_v8  ;;  %2270 = vmatprep.mubr.msk.f32.mxu1 %vm2712_vm3, %v2713_v12 }
  0x22   :  { %2453 = vmatprep.subr.bf16.mxu1 %v2711_v11 }
  0x25   :  { %2455 = vmatpush3.bf16.msra.mxu1 %v2828_v13 }
  0x26   :  { %2462 = vmatprep.subr.bf16.mxu1 %v2711_v11 }
  0xe9   :  { %v2234_v14 = vpop.f32.mrb[0].mxu1 }
  0xea   :  { %v2239_v15 = vpop.f32.mrb[0].mxu0  ;;  %v133_v18 = vpop.f32.mrb[1].mxu1 }
  0xeb   :  { %v221_v17 = vadd.f32 %v2239_v15, %v2234_v14  ;;  %v215_v19 = vpop.f32.mrb[1].mxu0 }
  0xec   :  { %v216_v20 = vadd.f32 %v215_v19, %v133_v18 }
  0xed   :  { %v232_v21 = vadd.f32 %v2095_v16, %v221_v17 }
  0xee   :  { %v231_v22 = vadd.f32 %v2095_v16, %v216_v20 }
  0xef   :  { %234 = vst [vmem:[#allocation2 + $0x8] sm:$0xff] %v232_v21 }
  0xf0   :  { %233 = vst [vmem:[#allocation2] sm:$0xff] %v231_v22 }
  0xf3   :  { %v310_v23 = vpop.f32.mrb[2].mxu1 }
  0xf4   :  { %v2250_v24 = vpop.f32.mrb[3].mxu1 }
  0xf7   :  { %v239_v25 = vld [vmem:[#allocation2] sm:$0x3]  ;;  %v345_v41 = vld [vmem:[#allocation2 + $0x2] sm:$0x3]  ;;  %v448_v59 = vld [vmem:[#allocation2 + $0x4] sm:$0x3] }
  0xf8   :  { %v314_v26 = vadd.f32 %v310_v23, %v239_v25  ;;  %v551_v17 = vld [vmem:[#allocation2 + $0x6] sm:$0x3] }
  0xfa   :  { %2558 = vtanh.f32 %v314_v26  ;;  %v2096_v28 = vmul.f32 -1.442695, %v314_v26 }
  0xfc   :  { %2560 = vpow2.f32 %v2096_v28 }
 0x104   :  { %v2559_v27 = vpop.eup %2558 }
 0x105   :  { %324 = vrot.lane.b32.xlu0 %v2559_v27, %s2714_s27 }
 0x106   :  { %v2561_v29 = vpop.eup %2560 }
 0x107   :  { %v318_v30 = vadd.f32 1.0, %v2561_v29 }
 0x109   :  { %2562 = vrcp.f32 %v318_v30 }
 0x113   :  { %v2563_v31 = vpop.eup %2562 }
 0x114   :  { %v322_v34 = vmul.f32 0.0, %v2563_v31 }
 0x177   :  { %v325_v32 = vpop.permute.xlu0 %324 }
 0x178   :  { %v327_v33 = vmul.f32 %v2563_v31, %v325_v32 }
 0x17a   :  { %329 = vrot.lane.b32.xlu0 %v327_v33, %s2715_s5 }
 0x1ec   :  { %v330_v35 = vpop.permute.xlu0 %329 }
 0x1ed   :  { %v332_v36 = vadd.f32 %v330_v35, %v322_v34  ;;  %v654_v35 = vld [vmem:[#allocation2 + $0x8] sm:$0x3] }
 0x1ef   :  { %2564 = vtanh.f32 %v332_v36 }
 0x1f9   :  { %v2565_v37 = vpop.eup %2564 }
 0x1fa   :  { %335 = vrot.lane.b32.xlu1 %v2565_v37, %s2714_s27 }
 0x26c   :  { %v336_v38 = vpop.permute.xlu1 %335 }
 0x26d   :  { %v338_v39 = vmul.f32 %v2563_v31, %v336_v38 }
 0x26f   :  { %340 = vrot.lane.b32.xlu1 %v338_v39, %s2715_s5 }
 0x2e1   :  { %v341_v40 = vpop.permute.xlu1 %340 }
 0x2e2   :  { %344 = vst.msk [vmem:[#allocation3] sm:$0x3] %vm343_vm4, %v341_v40  ;;  %2260 = vmatmul.mubr.msk.f32.vlgmr.msra.gmra.mrb[2].mxu0 %vm240_vm5, %v341_v40 }
 0x2e3   :  { %2458 = vmatpush3.bf16.msra.mxu0 %v2814_v8  ;;  %2281 = vmatprep.mubr.msk.f32.mxu0 %vm2712_vm3, %v2713_v12 }
 0x2e4   :  { %2459 = vmatprep.subr.bf16.mxu0 %v2711_v11 }
 0x2e7   :  { %2461 = vmatpush3.bf16.msra.mxu0 %v2828_v13 }
 0x2e8   :  { %2468 = vmatprep.subr.bf16.mxu0 %v2711_v11 }
 0x3b5   :  { %v414_v42 = vpop.f32.mrb[2].mxu0 }
 0x3b6   :  { %v418_v43 = vadd.f32 %v414_v42, %v345_v41  ;;  %v2261_v44 = vpop.f32.mrb[3].mxu0 }
 0x3b8   :  { %2566 = vtanh.f32 %v418_v43  ;;  %v2098_v46 = vmul.f32 -1.442695, %v418_v43 }
 0x3ba   :  { %2568 = vpow2.f32 %v2098_v46 }
 0x3c2   :  { %v2567_v45 = vpop.eup %2566 }
 0x3c3   :  { %428 = vrot.lane.b32.xlu0 %v2567_v45, %s2714_s27 }
 0x3c4   :  { %v2569_v47 = vpop.eup %2568 }
 0x3c5   :  { %v422_v48 = vadd.f32 1.0, %v2569_v47 }
 0x3c7   :  { %2570 = vrcp.f32 %v422_v48 }
 0x3d1   :  { %v2571_v49 = vpop.eup %2570 }
 0x3d2   :  { %v426_v52 = vmul.f32 %v2571_v49, %v332_v36 }
 0x435   :  { %v429_v50 = vpop.permute.xlu0 %428 }
 0x436   :  { %v431_v51 = vmul.f32 %v2571_v49, %v429_v50 }
 0x438   :  { %433 = vrot.lane.b32.xlu1 %v431_v51, %s2715_s5 }
 0x4aa   :  { %v434_v53 = vpop.permute.xlu1 %433 }
 0x4ab   :  { %v436_v54 = vadd.f32 %v434_v53, %v426_v52  ;;  %v757_v53 = vld [vmem:[#allocation2 + $0xa] sm:$0x3] }
 0x4ad   :  { %2572 = vtanh.f32 %v436_v54 }
 0x4b7   :  { %v2573_v55 = vpop.eup %2572 }
 0x4b8   :  { %439 = vrot.lane.b32.xlu0 %v2573_v55, %s2714_s27 }
 0x52a   :  { %v440_v56 = vpop.permute.xlu0 %439 }
 0x52b   :  { %v442_v57 = vmul.f32 %v2571_v49, %v440_v56 }
 0x52d   :  { %444 = vrot.lane.b32.xlu1 %v442_v57, %s2715_s5 }
 0x59f   :  { %v445_v58 = vpop.permute.xlu1 %444 }
 0x5a0   :  { %447 = vst.msk [vmem:[#allocation3 + $0x2] sm:$0x3] %vm343_vm4, %v445_v58  ;;  %2271 = vmatmul.mubr.msk.f32.vlgmr.msra.gmra.mrb[4].mxu1 %vm240_vm5, %v445_v58 }
 0x5a1   :  { %2464 = vmatpush3.bf16.msra.mxu1 %v2814_v8  ;;  %2292 = vmatprep.mubr.msk.f32.mxu1 %vm2712_vm3, %v2713_v12 }
 0x5a2   :  { %2465 = vmatprep.subr.bf16.mxu1 %v2711_v11 }
 0x5a5   :  { %2467 = vmatpush3.bf16.msra.mxu1 %v2828_v13 }
 0x5a6   :  { %2474 = vmatprep.subr.bf16.mxu1 %v2711_v11 }
 0x673   :  { %v517_v60 = vpop.f32.mrb[4].mxu1 }
 0x674   :  { %v521_v61 = vadd.f32 %v517_v60, %v448_v59  ;;  %v2272_v62 = vpop.f32.mrb[5].mxu1 }
 0x676   :  { %2574 = vtanh.f32 %v521_v61  ;;  %v2100_v0 = vmul.f32 -1.442695, %v521_v61 }
 0x678   :  { %2576 = vpow2.f32 %v2100_v0 }
 0x680   :  { %v2575_v63 = vpop.eup %2574 }
 0x681   :  { %531 = vrot.lane.b32.xlu0 %v2575_v63, %s2714_s27 }
 0x682   :  { %v2577_v1 = vpop.eup %2576 }
 0x683   :  { %v525_v2 = vadd.f32 1.0, %v2577_v1 }
 0x685   :  { %2578 = vrcp.f32 %v525_v2 }
 0x68f   :  { %v2579_v3 = vpop.eup %2578 }
 0x690   :  { %v529_v6 = vmul.f32 %v2579_v3, %v436_v54 }
 0x6f3   :  { %v532_v4 = vpop.permute.xlu0 %531 }
 0x6f4   :  { %v534_v5 = vmul.f32 %v2579_v3, %v532_v4 }
 0x6f6   :  { %536 = vrot.lane.b32.xlu1 %v534_v5, %s2715_s5 }
 0x768   :  { %v537_v7 = vpop.permute.xlu1 %536 }
 0x769   :  { %v539_v9 = vadd.f32 %v537_v7, %v529_v6  ;;  %v860_v6 = vld [vmem:[#allocation2 + $0xc] sm:$0x3] }
 0x76b   :  { %2580 = vtanh.f32 %v539_v9 }
 0x775   :  { %v2581_v10 = vpop.eup %2580 }
 0x776   :  { %542 = vrot.lane.b32.xlu0 %v2581_v10, %s2714_s27 }
 0x7e8   :  { %v543_v14 = vpop.permute.xlu0 %542 }
 0x7e9   :  { %v545_v15 = vmul.f32 %v2579_v3, %v543_v14 }
 0x7eb   :  { %547 = vrot.lane.b32.xlu1 %v545_v15, %s2715_s5 }
 0x85d   :  { %v548_v16 = vpop.permute.xlu1 %547 }
 0x85e   :  { %550 = vst.msk [vmem:[#allocation3 + $0x4] sm:$0x3] %vm343_vm4, %v548_v16  ;;  %2282 = vmatmul.mubr.msk.f32.vlgmr.msra.gmra.mrb[4].mxu0 %vm240_vm5, %v548_v16 }
 0x85f   :  { %2470 = vmatpush3.bf16.msra.mxu0 %v2814_v8  ;;  %2303 = vmatprep.mubr.msk.f32.mxu0 %vm2712_vm3, %v2713_v12 }
 0x860   :  { %2471 = vmatprep.subr.bf16.mxu0 %v2711_v11 }
 0x863   :  { %2473 = vmatpush3.bf16.msra.mxu0 %v2828_v13 }
 0x864   :  { %2480 = vmatprep.subr.bf16.mxu0 %v2711_v11 }
 0x931   :  { %v620_v18 = vpop.f32.mrb[4].mxu0 }
 0x932   :  { %v624_v19 = vadd.f32 %v620_v18, %v551_v17  ;;  %v2283_v20 = vpop.f32.mrb[5].mxu0 }
 0x934   :  { %2582 = vtanh.f32 %v624_v19  ;;  %v2102_v22 = vmul.f32 -1.442695, %v624_v19 }
 0x936   :  { %2584 = vpow2.f32 %v2102_v22 }
 0x93e   :  { %v2583_v21 = vpop.eup %2582 }
 0x93f   :  { %634 = vrot.lane.b32.xlu0 %v2583_v21, %s2714_s27 }
 0x940   :  { %v2585_v23 = vpop.eup %2584 }
 0x941   :  { %v628_v24 = vadd.f32 1.0, %v2585_v23 }
 0x943   :  { %2586 = vrcp.f32 %v628_v24 }
 0x94d   :  { %v2587_v25 = vpop.eup %2586 }
 0x94e   :  { %v632_v28 = vmul.f32 %v2587_v25, %v539_v9 }
 0x9b1   :  { %v635_v26 = vpop.permute.xlu0 %634 }
 0x9b2   :  { %v637_v27 = vmul.f32 %v2587_v25, %v635_v26 }
 0x9b4   :  { %639 = vrot.lane.b32.xlu1 %v637_v27, %s2715_s5 }
 0xa26   :  { %v640_v29 = vpop.permute.xlu1 %639 }
 0xa27   :  { %v642_v30 = vadd.f32 %v640_v29, %v632_v28  ;;  %v963_v28 = vld [vmem:[#allocation2 + $0xe] sm:$0x3] }
 0xa29   :  { %2588 = vtanh.f32 %v642_v30 }
 0xa33   :  { %v2589_v31 = vpop.eup %2588 }
 0xa34   :  { %645 = vrot.lane.b32.xlu0 %v2589_v31, %s2714_s27 }
 0xaa6   :  { %v646_v32 = vpop.permute.xlu0 %645 }
 0xaa7   :  { %v648_v33 = vmul.f32 %v2587_v25, %v646_v32 }
 0xaa9   :  { %650 = vrot.lane.b32.xlu1 %v648_v33, %s2715_s5 }
 0xb1b   :  { %v651_v34 = vpop.permute.xlu1 %650 }
 0xb1c   :  { %653 = vst.msk [vmem:[#allocation3 + $0x6] sm:$0x3] %vm343_vm4, %v651_v34  ;;  %2293 = vmatmul.mubr.msk.f32.vlgmr.msra.gmra.mrb[6].mxu1 %vm240_vm5, %v651_v34 }
 0xb1d   :  { %2476 = vmatpush3.bf16.msra.mxu1 %v2814_v8  ;;  %2314 = vmatprep.mubr.msk.f32.mxu1 %vm2712_vm3, %v2713_v12 }
 0xb1e   :  { %2477 = vmatprep.subr.bf16.mxu1 %v2711_v11 }
 0xb21   :  { %2479 = vmatpush3.bf16.msra.mxu1 %v2828_v13 }
 0xb23   :  { %v1066_v5 = vld [vmem:[#allocation3] sm:$0xff] }
 0xbef   :  { %v723_v36 = vpop.f32.mrb[6].mxu1 }
 0xbf0   :  { %v727_v37 = vadd.f32 %v723_v36, %v654_v35  ;;  %v2294_v38 = vpop.f32.mrb[7].mxu1 }
 0xbf2   :  { %2590 = vtanh.f32 %v727_v37  ;;  %v2104_v40 = vmul.f32 -1.442695, %v727_v37 }
 0xbf4   :  { %2592 = vpow2.f32 %v2104_v40 }
 0xbfc   :  { %v2591_v39 = vpop.eup %2590 }
 0xbfd   :  { %737 = vrot.lane.b32.xlu0 %v2591_v39, %s2714_s27 }
 0xbfe   :  { %v2593_v41 = vpop.eup %2592 }
 0xbff   :  { %v731_v42 = vadd.f32 1.0, %v2593_v41 }
 0xc01   :  { %2594 = vrcp.f32 %v731_v42 }
 0xc0b   :  { %v2595_v43 = vpop.eup %2594 }
 0xc0c   :  { %v735_v46 = vmul.f32 %v2595_v43, %v642_v30 }
 0xc6f   :  { %v738_v44 = vpop.permute.xlu0 %737 }
 0xc70   :  { %v740_v45 = vmul.f32 %v2595_v43, %v738_v44  ;;  %v1069_v44 = vld [vmem:[%s3080_s6 + $0x8] sm:$0xff] }
 0xc72   :  { %742 = vrot.lane.b32.xlu1 %v740_v45, %s2715_s5 }
 0xce4   :  { %v743_v47 = vpop.permute.xlu1 %742 }
 0xce5   :  { %v745_v48 = vadd.f32 %v743_v47, %v735_v46  ;;  %v1070_v46 = vld [vmem:[%s3080_s6 + $0x10] sm:$0xff]  ;;  %v1071_v47 = vld [vmem:[%s3080_s6 + $0x18] sm:$0xff] }
 0xce7   :  { %2596 = vtanh.f32 %v745_v48 }
 0xcf1   :  { %v2597_v49 = vpop.eup %2596 }
 0xcf2   :  { %748 = vrot.lane.b32.xlu0 %v2597_v49, %s2714_s27  ;;  %v1162_v49 = vld [vmem:[%s3081_s7] sm:$0xff] }
 0xd64   :  { %v749_v50 = vpop.permute.xlu0 %748 }
 0xd65   :  { %v751_v51 = vmul.f32 %v2595_v43, %v749_v50  ;;  %v1068_v43 = vld [vmem:[%s3080_s6] sm:$0xff]  ;;  %v1163_v50 = vld [vmem:[%s3081_s7 + $0x8] sm:$0xff] }
 0xd66   :  { %v2486_v45 = vpack.c.bf16 %v1069_v44, %v1068_v43 }
 0xd67   :  { %753 = vrot.lane.b32.xlu1 %v751_v51, %s2715_s5  ;;  %v1164_v51 = vld [vmem:[%s3081_s7 + $0x10] sm:$0xff] }
 0xd68   :  { %2487 = vmatprep.subr.bf16.mxu1 %v2486_v45 }
 0xdd9   :  { %v754_v52 = vpop.permute.xlu1 %753 }
 0xdda   :  { %756 = vst.msk [vmem:[#allocation3 + $0x8] sm:$0x3] %vm343_vm4, %v754_v52  ;;  %2304 = vmatmul.mubr.msk.f32.vlgmr.msra.gmra.mrb[6].mxu0 %vm240_vm5, %v754_v52  ;;  %v2949_v52 = vpack.c.bf16 %v1163_v50, %v1162_v49 }
 0xddb   :  { %2482 = vmatpush3.bf16.msra.mxu0 %v2814_v8  ;;  %2325 = vmatprep.mubr.msk.f32.mxu0 %vm2712_vm3, %v2713_v12 }
 0xddc   :  { %2483 = vmatprep.subr.bf16.mxu0 %v2711_v11 }
 0xddf   :  { %2485 = vmatpush3.bf16.msra.mxu0 %v2828_v13 }
 0xde0   :  { %2494 = vmatprep.subr.bf16.mxu0 %v2711_v11 }
 0xead   :  { %v826_v54 = vpop.f32.mrb[6].mxu0 }
 0xeae   :  { %v830_v55 = vadd.f32 %v826_v54, %v757_v53  ;;  %v2305_v56 = vpop.f32.mrb[7].mxu0  ;;  %v1165_v53 = vld [vmem:[%s3081_s7 + $0x18] sm:$0xff] }
 0xeaf   :  { %v2955_v56 = vpack.c.bf16 %v1165_v53, %v1164_v51 }
 0xeb0   :  { %2598 = vtanh.f32 %v830_v55  ;;  %v2106_v58 = vmul.f32 -1.442695, %v830_v55 }
 0xeb2   :  { %2600 = vpow2.f32 %v2106_v58 }
 0xeba   :  { %v2599_v57 = vpop.eup %2598 }
 0xebb   :  { %840 = vrot.lane.b32.xlu0 %v2599_v57, %s2714_s27 }
 0xebc   :  { %v2601_v8 = vpop.eup %2600 }
 0xebd   :  { %v834_v59 = vadd.f32 1.0, %v2601_v8 }
 0xebf   :  { %2602 = vrcp.f32 %v834_v59 }
 0xec9   :  { %v2603_v60 = vpop.eup %2602 }
 0xeca   :  { %v838_v13 = vmul.f32 %v2603_v60, %v745_v48  ;;  %v2490_v48 = vpack.c.bf16 %v1071_v47, %v1070_v46 }
 0xf2d   :  { %v841_v61 = vpop.permute.xlu0 %840 }
 0xf2e   :  { %v843_v62 = vmul.f32 %v2603_v60, %v841_v61 }
 0xf30   :  { %845 = vrot.lane.b32.xlu1 %v843_v62, %s2715_s5 }
 0xfa2   :  { %v846_v63 = vpop.permute.xlu1 %845 }
 0xfa3   :  { %v848_v0 = vadd.f32 %v846_v63, %v838_v13 }
 0xfa5   :  { %2604 = vtanh.f32 %v848_v0 }
 0xfaf   :  { %v2605_v1 = vpop.eup %2604 }
 0xfb0   :  { %851 = vrot.lane.b32.xlu0 %v2605_v1, %s2714_s27 }
0x1022   :  { %v852_v2 = vpop.permute.xlu0 %851 }
0x1023   :  { %v854_v3 = vmul.f32 %v2603_v60, %v852_v2  ;;  %v2111_v60 = vld [vmem:[%s3082_s8] ss:$0 sm:$0xff] }
0x1025   :  { %856 = vrot.lane.b32.xlu1 %v854_v3, %s2715_s5 }
0x1097   :  { %v857_v4 = vpop.permute.xlu1 %856 }
0x1098   :  { %859 = vst.msk [vmem:[#allocation3 + $0xa] sm:$0x3] %vm343_vm4, %v857_v4  ;;  %2315 = vmatmul.mubr.msk.f32.vlgmr.msra.gmra.mrb[8].mxu1 %vm240_vm5, %v857_v4 }
0x1099   :  { %2336 = vmatprep.mubr.msk.f32.mxu1 %vm240_vm5, %v1066_v5  ;;  %2489 = vmatpush3.bf16.msra.mxu1 %v2486_v45 }
0x109a   :  { %2491 = vmatprep.subr.bf16.mxu1 %v2490_v48 }
0x109d   :  { %2493 = vmatpush3.bf16.msra.mxu1 %v2490_v48 }
0x109e   :  { %2500 = vmatprep.subr.bf16.mxu1 %v2711_v11 }
0x116b   :  { %v929_v7 = vpop.f32.mrb[8].mxu1 }
0x116c   :  { %v933_v9 = vadd.f32 %v929_v7, %v860_v6  ;;  %v2316_v10 = vpop.f32.mrb[9].mxu1 }
0x116e   :  { %2606 = vtanh.f32 %v933_v9  ;;  %v2108_v15 = vmul.f32 -1.442695, %v933_v9 }
0x1170   :  { %2608 = vpow2.f32 %v2108_v15 }
0x1178   :  { %v2607_v14 = vpop.eup %2606 }
0x1179   :  { %943 = vrot.lane.b32.xlu0 %v2607_v14, %s2714_s27 }
0x117a   :  { %v2609_v16 = vpop.eup %2608 }
0x117b   :  { %v937_v17 = vadd.f32 1.0, %v2609_v16 }
0x117d   :  { %2610 = vrcp.f32 %v937_v17 }
0x1187   :  { %v2611_v18 = vpop.eup %2610 }
0x1188   :  { %v941_v21 = vmul.f32 %v2611_v18, %v848_v0 }
0x11eb   :  { %v944_v19 = vpop.permute.xlu0 %943 }
0x11ec   :  { %v946_v20 = vmul.f32 %v2611_v18, %v944_v19 }
0x11ee   :  { %948 = vrot.lane.b32.xlu1 %v946_v20, %s2715_s5 }
0x1260   :  { %v949_v22 = vpop.permute.xlu1 %948 }
0x1261   :  { %v951_v23 = vadd.f32 %v949_v22, %v941_v21 }
0x1263   :  { %2612 = vtanh.f32 %v951_v23 }
0x126d   :  { %v2613_v24 = vpop.eup %2612 }
0x126e   :  { %954 = vrot.lane.b32.xlu0 %v2613_v24, %s2714_s27 }
0x12e0   :  { %v955_v25 = vpop.permute.xlu0 %954 }
0x12e1   :  { %v957_v26 = vmul.f32 %v2611_v18, %v955_v25 }
0x12e3   :  { %959 = vrot.lane.b32.xlu1 %v957_v26, %s2715_s5 }
0x1355   :  { %v960_v27 = vpop.permute.xlu1 %959 }
0x1356   :  { %962 = vst.msk [vmem:[#allocation3 + $0xc] sm:$0x3] %vm343_vm4, %v960_v27  ;;  %2326 = vmatmul.mubr.msk.f32.vlgmr.msra.gmra.mrb[8].mxu0 %vm240_vm5, %v960_v27 }
0x1357   :  { %2347 = vmatprep.mubr.msk.f32.mxu0 %vm2712_vm3, %v2713_v12  ;;  %2496 = vmatpush3.bf16.msra.mxu0 %v2949_v52 }
0x1358   :  { %2497 = vmatprep.subr.bf16.mxu0 %v2711_v11 }
0x135b   :  { %2499 = vmatpush3.bf16.msra.mxu0 %v2955_v56 }
0x135c   :  { %2506 = vmatprep.subr.bf16.mxu0 %v2711_v11 }
0x135e   :  { %2348 = vmatmul.mubr.f32.vlgmr.msra.gmra.mrb[10].mxu0 %v2713_v12 }
0x135f   :  { %2508 = vmatpush3.bf16.msra.mxu0 %v2949_v52  ;;  %2369 = vmatprep.mubr.msk.f32.mxu0 %vm2712_vm3, %v2713_v12 }
0x1360   :  { %2509 = vmatprep.subr.bf16.mxu0 %v2711_v11 }
0x1363   :  { %2511 = vmatpush3.bf16.msra.mxu0 %v2955_v56 }
0x1364   :  { %2518 = vmatprep.subr.bf16.mxu0 %v2711_v11 }
0x1429   :  { %v1032_v29 = vpop.f32.mrb[8].mxu0 }
0x142a   :  { %v1036_v30 = vadd.f32 %v1032_v29, %v963_v28  ;;  %v2327_v31 = vpop.f32.mrb[9].mxu0 }
0x142c   :  { %2614 = vtanh.f32 %v1036_v30  ;;  %v2110_v33 = vmul.f32 -1.442695, %v1036_v30 }
0x142e   :  { %2616 = vpow2.f32 %v2110_v33 }
0x1431   :  { %v1233_v8 = vpop.f32.mrb[10].mxu0 }
0x1432   :  { %v2349_v59 = vpop.f32.mrb[11].mxu0 }
0x1436   :  { %v2615_v32 = vpop.eup %2614 }
0x1437   :  { %1046 = vrot.lane.b32.xlu0 %v2615_v32, %s2714_s27 }
0x1438   :  { %v2617_v34 = vpop.eup %2616 }
0x1439   :  { %v1040_v35 = vadd.f32 1.0, %v2617_v34 }
0x143b   :  { %2618 = vrcp.f32 %v1040_v35 }
0x1445   :  { %v2619_v36 = vpop.eup %2618 }
0x1446   :  { %v1044_v39 = vmul.f32 %v2619_v36, %v951_v23 }
0x14a9   :  { %v1047_v37 = vpop.permute.xlu0 %1046 }
0x14aa   :  { %v1049_v38 = vmul.f32 %v2619_v36, %v1047_v37 }
0x14ac   :  { %1051 = vrot.lane.b32.xlu1 %v1049_v38, %s2715_s5 }
0x151e   :  { %v1052_v40 = vpop.permute.xlu1 %1051 }
0x151f   :  { %v1054_v41 = vadd.f32 %v1052_v40, %v1044_v39 }
0x1521   :  { %2620 = vtanh.f32 %v1054_v41 }
0x152b   :  { %v2621_v42 = vpop.eup %2620 }
0x152c   :  { %1057 = vrot.lane.b32.xlu0 %v2621_v42, %s2714_s27 }
0x159e   :  { %v1058_v54 = vpop.permute.xlu0 %1057 }
0x159f   :  { %v1060_v55 = vmul.f32 %v2619_v36, %v1058_v54 }
0x15a1   :  { %1062 = vrot.lane.b32.xlu1 %v1060_v55, %s2715_s5 }
0x1613   :  { %v1063_v57 = vpop.permute.xlu1 %1062 }
0x1614   :  { %1065 = vst.msk [vmem:[#allocation3 + $0xe] sm:$0x3] %vm343_vm4, %v1063_v57 }
0x161b   :  { %v1067_v58 = vld [vmem:[#allocation3 + $0x8] sm:$0xff] }
0x161c   :  { %2337 = vmatmul.mubr.msk.f32.vlgmr.msra.gmra.mrb[10].mxu1 %vm240_vm5, %v1067_v58 }
0x161d   :  { %2502 = vmatpush3.bf16.msra.mxu1 %v2949_v52  ;;  %2358 = vmatprep.mubr.msk.f32.mxu1 %vm2712_vm3, %v2713_v12 }
0x161e   :  { %2503 = vmatprep.subr.bf16.mxu1 %v2711_v11 }
0x1621   :  { %2505 = vmatpush3.bf16.msra.mxu1 %v2955_v56 }
0x1622   :  { %2512 = vmatprep.subr.bf16.mxu1 %v2711_v11 }
0x16ef   :  { %v2338_v61 = vpop.f32.mrb[10].mxu1 }
0x16f0   :  { %v1157_v62 = vadd.f32 %v2338_v61, %v2111_v60  ;;  %v1151_v13 = vpop.f32.mrb[11].mxu1 }
0x16f1   :  { %v1152_v63 = vadd.f32 %v2111_v60, %v1151_v13 }
0x16f2   :  { %1161 = vst [vmem:[#allocation2 + $0x8] sm:$0xff] %v1157_v62 }
0x16f3   :  { %1160 = vst [vmem:[#allocation2] sm:$0xff] %v1152_v63 }
0x16fa   :  { %v1166_v0 = vld [vmem:[#allocation2] sm:$0x3]  ;;  %v1267_v20 = vld [vmem:[#allocation2 + $0x2] sm:$0x3]  ;;  %v1370_v38 = vld [vmem:[#allocation2 + $0x4] sm:$0x3] }
0x16fb   :  { %v1237_v1 = vadd.f32 %v1233_v8, %v1166_v0  ;;  %v1473_v58 = vld [vmem:[#allocation2 + $0x6] sm:$0x3] }
0x16fd   :  { %2622 = vtanh.f32 %v1237_v1  ;;  %v2114_v3 = vmul.f32 -1.442695, %v1237_v1 }
0x16ff   :  { %2624 = vpow2.f32 %v2114_v3 }
0x1707   :  { %v2623_v2 = vpop.eup %2622 }
0x1708   :  { %1247 = vrot.lane.b32.xlu0 %v2623_v2, %s2714_s27 }
0x1709   :  { %v2625_v4 = vpop.eup %2624 }
0x170a   :  { %v1241_v5 = vadd.f32 1.0, %v2625_v4 }
0x170c   :  { %2626 = vrcp.f32 %v1241_v5 }
0x1716   :  { %v2627_v6 = vpop.eup %2626 }
0x1717   :  { %v1245_v10 = vmul.f32 0.0, %v2627_v6 }
0x177a   :  { %v1248_v7 = vpop.permute.xlu0 %1247 }
0x177b   :  { %v1250_v9 = vmul.f32 %v2627_v6, %v1248_v7 }
0x177d   :  { %1252 = vrot.lane.b32.xlu1 %v1250_v9, %s2715_s5 }
0x17ef   :  { %v1253_v14 = vpop.permute.xlu1 %1252 }
0x17f0   :  { %v1255_v15 = vadd.f32 %v1253_v14, %v1245_v10  ;;  %v1576_v14 = vld [vmem:[#allocation2 + $0x8] sm:$0x3] }
0x17f2   :  { %2628 = vtanh.f32 %v1255_v15 }
0x17fc   :  { %v2629_v16 = vpop.eup %2628 }
0x17fd   :  { %1258 = vrot.lane.b32.xlu0 %v2629_v16, %s2714_s27 }
0x186f   :  { %v1259_v17 = vpop.permute.xlu0 %1258 }
0x1870   :  { %v1261_v18 = vmul.f32 %v2627_v6, %v1259_v17 }
0x1872   :  { %1263 = vrot.lane.b32.xlu1 %v1261_v18, %s2715_s5 }
0x18e4   :  { %v1264_v19 = vpop.permute.xlu1 %1263 }
0x18e5   :  { %1266 = vst.msk [vmem:[#allocation3] sm:$0x3] %vm343_vm4, %v1264_v19  ;;  %2359 = vmatmul.mubr.msk.f32.vlgmr.msra.gmra.mrb[12].mxu1 %vm240_vm5, %v1264_v19 }
0x18e6   :  { %2514 = vmatpush3.bf16.msra.mxu1 %v2949_v52  ;;  %2380 = vmatprep.mubr.msk.f32.mxu1 %vm2712_vm3, %v2713_v12 }
0x18e7   :  { %2515 = vmatprep.subr.bf16.mxu1 %v2711_v11 }
0x18ea   :  { %2517 = vmatpush3.bf16.msra.mxu1 %v2955_v56 }
0x18eb   :  { %2524 = vmatprep.subr.bf16.mxu1 %v2711_v11 }
0x19b8   :  { %v1336_v21 = vpop.f32.mrb[12].mxu1 }
0x19b9   :  { %v1340_v22 = vadd.f32 %v1336_v21, %v1267_v20  ;;  %v2360_v23 = vpop.f32.mrb[13].mxu1 }
0x19bb   :  { %2630 = vtanh.f32 %v1340_v22  ;;  %v2116_v25 = vmul.f32 -1.442695, %v1340_v22 }
0x19bd   :  { %2632 = vpow2.f32 %v2116_v25 }
0x19c5   :  { %v2631_v24 = vpop.eup %2630 }
0x19c6   :  { %1350 = vrot.lane.b32.xlu0 %v2631_v24, %s2714_s27 }
0x19c7   :  { %v2633_v26 = vpop.eup %2632 }
0x19c8   :  { %v1344_v27 = vadd.f32 1.0, %v2633_v26 }
0x19ca   :  { %2634 = vrcp.f32 %v1344_v27 }
0x19d4   :  { %v2635_v28 = vpop.eup %2634 }
0x19d5   :  { %v1348_v31 = vmul.f32 %v2635_v28, %v1255_v15 }
0x1a38   :  { %v1351_v29 = vpop.permute.xlu0 %1350 }
0x1a39   :  { %v1353_v30 = vmul.f32 %v2635_v28, %v1351_v29 }
0x1a3b   :  { %1355 = vrot.lane.b32.xlu1 %v1353_v30, %s2715_s5 }
0x1aad   :  { %v1356_v32 = vpop.permute.xlu1 %1355 }
0x1aae   :  { %v1358_v33 = vadd.f32 %v1356_v32, %v1348_v31  ;;  %v1679_v32 = vld [vmem:[#allocation2 + $0xa] sm:$0x3] }
0x1ab0   :  { %2636 = vtanh.f32 %v1358_v33 }
0x1aba   :  { %v2637_v34 = vpop.eup %2636 }
0x1abb   :  { %1361 = vrot.lane.b32.xlu0 %v2637_v34, %s2714_s27 }
0x1b2d   :  { %v1362_v35 = vpop.permute.xlu0 %1361 }
0x1b2e   :  { %v1364_v36 = vmul.f32 %v2635_v28, %v1362_v35 }
0x1b30   :  { %1366 = vrot.lane.b32.xlu1 %v1364_v36, %s2715_s5 }
0x1ba2   :  { %v1367_v37 = vpop.permute.xlu1 %1366 }
0x1ba3   :  { %1369 = vst.msk [vmem:[#allocation3 + $0x2] sm:$0x3] %vm343_vm4, %v1367_v37  ;;  %2370 = vmatmul.mubr.msk.f32.vlgmr.msra.gmra.mrb[12].mxu0 %vm240_vm5, %v1367_v37 }
0x1ba4   :  { %2520 = vmatpush3.bf16.msra.mxu0 %v2949_v52  ;;  %2391 = vmatprep.mubr.msk.f32.mxu0 %vm2712_vm3, %v2713_v12 }
0x1ba5   :  { %2521 = vmatprep.subr.bf16.mxu0 %v2711_v11 }
0x1ba8   :  { %2523 = vmatpush3.bf16.msra.mxu0 %v2955_v56 }
0x1ba9   :  { %2530 = vmatprep.subr.bf16.mxu0 %v2711_v11 }
0x1c76   :  { %v1439_v39 = vpop.f32.mrb[12].mxu0 }
0x1c77   :  { %v1443_v40 = vadd.f32 %v1439_v39, %v1370_v38  ;;  %v2371_v41 = vpop.f32.mrb[13].mxu0 }
0x1c79   :  { %2638 = vtanh.f32 %v1443_v40  ;;  %v2118_v43 = vmul.f32 -1.442695, %v1443_v40 }
0x1c7b   :  { %2640 = vpow2.f32 %v2118_v43 }
0x1c83   :  { %v2639_v42 = vpop.eup %2638 }
0x1c84   :  { %1453 = vrot.lane.b32.xlu0 %v2639_v42, %s2714_s27 }
0x1c85   :  { %v2641_v44 = vpop.eup %2640 }
0x1c86   :  { %v1447_v45 = vadd.f32 1.0, %v2641_v44 }
0x1c88   :  { %2642 = vrcp.f32 %v1447_v45 }
0x1c92   :  { %v2643_v46 = vpop.eup %2642 }
0x1c93   :  { %v1451_v49 = vmul.f32 %v2643_v46, %v1358_v33 }
0x1cf6   :  { %v1454_v47 = vpop.permute.xlu0 %1453 }
0x1cf7   :  { %v1456_v48 = vmul.f32 %v2643_v46, %v1454_v47  ;;  %v1782_v47 = vld [vmem:[#allocation2 + $0xc] sm:$0x3] }
0x1cf9   :  { %1458 = vrot.lane.b32.xlu1 %v1456_v48, %s2715_s5 }
0x1d6b   :  { %v1459_v50 = vpop.permute.xlu1 %1458 }
0x1d6c   :  { %v1461_v51 = vadd.f32 %v1459_v50, %v1451_v49 }
0x1d6e   :  { %2644 = vtanh.f32 %v1461_v51 }
0x1d78   :  { %v2645_v53 = vpop.eup %2644 }
0x1d79   :  { %1464 = vrot.lane.b32.xlu0 %v2645_v53, %s2714_s27 }
0x1deb   :  { %v1465_v54 = vpop.permute.xlu0 %1464 }
0x1dec   :  { %v1467_v55 = vmul.f32 %v2643_v46, %v1465_v54 }
0x1dee   :  { %1469 = vrot.lane.b32.xlu1 %v1467_v55, %s2715_s5 }
0x1e60   :  { %v1470_v57 = vpop.permute.xlu1 %1469 }
0x1e61   :  { %1472 = vst.msk [vmem:[#allocation3 + $0x4] sm:$0x3] %vm343_vm4, %v1470_v57  ;;  %2381 = vmatmul.mubr.msk.f32.vlgmr.msra.gmra.mrb[14].mxu1 %vm240_vm5, %v1470_v57 }
0x1e62   :  { %2526 = vmatpush3.bf16.msra.mxu1 %v2949_v52  ;;  %2402 = vmatprep.mubr.msk.f32.mxu1 %vm2712_vm3, %v2713_v12 }
0x1e63   :  { %2527 = vmatprep.subr.bf16.mxu1 %v2711_v11 }
0x1e66   :  { %2529 = vmatpush3.bf16.msra.mxu1 %v2955_v56 }
0x1e67   :  { %2536 = vmatprep.subr.bf16.mxu1 %v2711_v11 }
0x1f34   :  { %v1542_v8 = vpop.f32.mrb[14].mxu1 }
0x1f35   :  { %v1546_v59 = vadd.f32 %v1542_v8, %v1473_v58  ;;  %v2382_v60 = vpop.f32.mrb[15].mxu1 }
0x1f37   :  { %2646 = vtanh.f32 %v1546_v59  ;;  %v2120_v62 = vmul.f32 -1.442695, %v1546_v59 }
0x1f39   :  { %2648 = vpow2.f32 %v2120_v62 }
0x1f41   :  { %v2647_v61 = vpop.eup %2646 }
0x1f42   :  { %1556 = vrot.lane.b32.xlu0 %v2647_v61, %s2714_s27 }
0x1f43   :  { %v2649_v13 = vpop.eup %2648 }
0x1f44   :  { %v1550_v63 = vadd.f32 1.0, %v2649_v13 }
0x1f46   :  { %2650 = vrcp.f32 %v1550_v63 }
0x1f50   :  { %v2651_v0 = vpop.eup %2650 }
0x1f51   :  { %v1554_v3 = vmul.f32 %v2651_v0, %v1461_v51 }
0x1fb4   :  { %v1557_v1 = vpop.permute.xlu0 %1556 }
0x1fb5   :  { %v1559_v2 = vmul.f32 %v2651_v0, %v1557_v1  ;;  %v1885_v1 = vld [vmem:[#allocation2 + $0xe] sm:$0x3] }
0x1fb7   :  { %1561 = vrot.lane.b32.xlu1 %v1559_v2, %s2715_s5 }
0x2029   :  { %v1562_v4 = vpop.permute.xlu1 %1561 }
0x202a   :  { %v1564_v5 = vadd.f32 %v1562_v4, %v1554_v3 }
0x202c   :  { %2652 = vtanh.f32 %v1564_v5 }
0x2036   :  { %v2653_v6 = vpop.eup %2652 }
0x2037   :  { %1567 = vrot.lane.b32.xlu0 %v2653_v6, %s2714_s27 }
0x20a9   :  { %v1568_v7 = vpop.permute.xlu0 %1567 }
0x20aa   :  { %v1570_v9 = vmul.f32 %v2651_v0, %v1568_v7 }
0x20ac   :  { %1572 = vrot.lane.b32.xlu1 %v1570_v9, %s2715_s5 }
0x211e   :  { %v1573_v10 = vpop.permute.xlu1 %1572 }
0x211f   :  { %1575 = vst.msk [vmem:[#allocation3 + $0x6] sm:$0x3] %vm343_vm4, %v1573_v10  ;;  %2392 = vmatmul.mubr.msk.f32.vlgmr.msra.gmra.mrb[14].mxu0 %vm240_vm5, %v1573_v10 }
0x2120   :  { %2532 = vmatpush3.bf16.msra.mxu0 %v2949_v52  ;;  %2413 = vmatprep.mubr.msk.f32.mxu0 %vm2712_vm3, %v2713_v12 }
0x2121   :  { %2533 = vmatprep.subr.bf16.mxu0 %v2711_v11 }
0x2124   :  { %2535 = vmatpush3.bf16.msra.mxu0 %v2955_v56 }
0x2126   :  { %v1988_v46 = vld [vmem:[#allocation3] sm:$0xff] }
0x21f2   :  { %v1645_v15 = vpop.f32.mrb[14].mxu0 }
0x21f3   :  { %v1649_v16 = vadd.f32 %v1645_v15, %v1576_v14  ;;  %v2393_v17 = vpop.f32.mrb[15].mxu0 }
0x21f5   :  { %2654 = vtanh.f32 %v1649_v16  ;;  %v2122_v19 = vmul.f32 -1.442695, %v1649_v16 }
0x21f7   :  { %2656 = vpow2.f32 %v2122_v19 }
0x21ff   :  { %v2655_v18 = vpop.eup %2654 }
0x2200   :  { %1659 = vrot.lane.b32.xlu0 %v2655_v18, %s2714_s27 }
0x2201   :  { %v2657_v20 = vpop.eup %2656 }
0x2202   :  { %v1653_v21 = vadd.f32 1.0, %v2657_v20  ;;  %v1990_v20 = vld [vmem:[%s3083_s9] sm:$0xff] }
0x2204   :  { %2658 = vrcp.f32 %v1653_v21  ;;  %v1991_v21 = vld [vmem:[%s3083_s9 + $0x8] sm:$0xff] }
0x220e   :  { %v2659_v22 = vpop.eup %2658 }
0x220f   :  { %v1657_v25 = vmul.f32 %v2659_v22, %v1564_v5 }
0x2272   :  { %v1660_v23 = vpop.permute.xlu0 %1659 }
0x2273   :  { %v1662_v24 = vmul.f32 %v2659_v22, %v1660_v23  ;;  %v1992_v23 = vld [vmem:[%s3083_s9 + $0x10] sm:$0xff] }
0x2275   :  { %1664 = vrot.lane.b32.xlu1 %v1662_v24, %s2715_s5  ;;  %v1993_v24 = vld [vmem:[%s3083_s9 + $0x18] sm:$0xff] }
0x22e7   :  { %v1665_v26 = vpop.permute.xlu1 %1664 }
0x22e8   :  { %v1667_v27 = vadd.f32 %v1665_v26, %v1657_v25  ;;  %v2546_v25 = vpack.c.bf16 %v1993_v24, %v1992_v23 }
0x22ea   :  { %2660 = vtanh.f32 %v1667_v27 }
0x22f4   :  { %v2661_v28 = vpop.eup %2660 }
0x22f5   :  { %1670 = vrot.lane.b32.xlu0 %v2661_v28, %s2714_s27 }
0x2367   :  { %v1671_v29 = vpop.permute.xlu0 %1670 }
0x2368   :  { %v1673_v30 = vmul.f32 %v2659_v22, %v1671_v29  ;;  %v2542_v22 = vpack.c.bf16 %v1991_v21, %v1990_v20 }
0x236a   :  { %1675 = vrot.lane.b32.xlu1 %v1673_v30, %s2715_s5  ;;  %2543 = vmatprep.subr.bf16.mxu0 %v2542_v22  ;;  %v2129_v30 = vld [vmem:[#allocation4] ss:$0 sm:$0xff] }
0x23dc   :  { %v1676_v31 = vpop.permute.xlu1 %1675 }
0x23dd   :  { %1678 = vst.msk [vmem:[#allocation3 + $0x8] sm:$0x3] %vm343_vm4, %v1676_v31  ;;  %2403 = vmatmul.mubr.msk.f32.vlgmr.msra.gmra.mrb[16].mxu1 %vm240_vm5, %v1676_v31 }
0x23de   :  { %2538 = vmatpush3.bf16.msra.mxu1 %v2949_v52  ;;  %2424 = vmatprep.mubr.msk.f32.mxu1 %vm2712_vm3, %v2713_v12 }
0x23df   :  { %2539 = vmatprep.subr.bf16.mxu1 %v2711_v11 }
0x23e2   :  { %2541 = vmatpush3.bf16.msra.mxu1 %v2955_v56 }
0x24b0   :  { %v1748_v33 = vpop.f32.mrb[16].mxu1 }
0x24b1   :  { %v1752_v34 = vadd.f32 %v1748_v33, %v1679_v32  ;;  %v2404_v35 = vpop.f32.mrb[17].mxu1 }
0x24b3   :  { %2662 = vtanh.f32 %v1752_v34  ;;  %v2124_v37 = vmul.f32 -1.442695, %v1752_v34 }
0x24b5   :  { %2664 = vpow2.f32 %v2124_v37 }
0x24bd   :  { %v2663_v36 = vpop.eup %2662 }
0x24be   :  { %1762 = vrot.lane.b32.xlu0 %v2663_v36, %s2714_s27 }
0x24bf   :  { %v2665_v38 = vpop.eup %2664 }
0x24c0   :  { %v1756_v39 = vadd.f32 1.0, %v2665_v38 }
0x24c2   :  { %2666 = vrcp.f32 %v1756_v39 }
0x24cc   :  { %v2667_v52 = vpop.eup %2666 }
0x24cd   :  { %v1760_v11 = vmul.f32 %v2667_v52, %v1667_v27 }
0x2530   :  { %v1763_v40 = vpop.permute.xlu0 %1762 }
0x2531   :  { %v1765_v12 = vmul.f32 %v2667_v52, %v1763_v40 }
0x2533   :  { %1767 = vrot.lane.b32.xlu1 %v1765_v12, %s2715_s5 }
0x25a5   :  { %v1768_v56 = vpop.permute.xlu1 %1767 }
0x25a6   :  { %v1770_v41 = vadd.f32 %v1768_v56, %v1760_v11 }
0x25a8   :  { %2668 = vtanh.f32 %v1770_v41 }
0x25b2   :  { %v2669_v42 = vpop.eup %2668 }
0x25b3   :  { %1773 = vrot.lane.b32.xlu0 %v2669_v42, %s2714_s27 }
0x2625   :  { %v1774_v43 = vpop.permute.xlu0 %1773 }
0x2626   :  { %v1776_v44 = vmul.f32 %v2667_v52, %v1774_v43 }
0x2628   :  { %1778 = vrot.lane.b32.xlu1 %v1776_v44, %s2715_s5 }
0x269a   :  { %v1779_v45 = vpop.permute.xlu1 %1778 }
0x269b   :  { %1781 = vst.msk [vmem:[#allocation3 + $0xa] sm:$0x3] %vm343_vm4, %v1779_v45  ;;  %2414 = vmatmul.mubr.msk.f32.vlgmr.msra.gmra.mrb[16].mxu0 %vm240_vm5, %v1779_v45 }
0x269c   :  { %2435 = vmatprep.mubr.msk.f32.mxu0 %vm240_vm5, %v1988_v46  ;;  %2545 = vmatpush3.bf16.msra.mxu0 %v2542_v22 }
0x269d   :  { %2547 = vmatprep.subr.bf16.mxu0 %v2546_v25 }
0x26a0   :  { %2549 = vmatpush3.bf16.msra.mxu0 %v2546_v25 }
0x276e   :  { %v1851_v48 = vpop.f32.mrb[16].mxu0 }
0x276f   :  { %v1855_v49 = vadd.f32 %v1851_v48, %v1782_v47  ;;  %v2415_v50 = vpop.f32.mrb[17].mxu0 }
0x2771   :  { %2670 = vtanh.f32 %v1855_v49  ;;  %v2126_v53 = vmul.f32 -1.442695, %v1855_v49 }
0x2773   :  { %2672 = vpow2.f32 %v2126_v53 }
0x277b   :  { %v2671_v51 = vpop.eup %2670 }
0x277c   :  { %1865 = vrot.lane.b32.xlu0 %v2671_v51, %s2714_s27 }
0x277d   :  { %v2673_v54 = vpop.eup %2672 }
0x277e   :  { %v1859_v55 = vadd.f32 1.0, %v2673_v54 }
0x2780   :  { %2674 = vrcp.f32 %v1859_v55 }
0x278a   :  { %v2675_v57 = vpop.eup %2674 }
0x278b   :  { %v1863_v59 = vmul.f32 %v2675_v57, %v1770_v41 }
0x27ee   :  { %v1866_v58 = vpop.permute.xlu0 %1865 }
0x27ef   :  { %v1868_v8 = vmul.f32 %v2675_v57, %v1866_v58 }
0x27f1   :  { %1870 = vrot.lane.b32.xlu1 %v1868_v8, %s2715_s5 }
0x2863   :  { %v1871_v60 = vpop.permute.xlu1 %1870 }
0x2864   :  { %v1873_v61 = vadd.f32 %v1871_v60, %v1863_v59 }
0x2866   :  { %2676 = vtanh.f32 %v1873_v61 }
0x2870   :  { %v2677_v62 = vpop.eup %2676 }
0x2871   :  { %1876 = vrot.lane.b32.xlu0 %v2677_v62, %s2714_s27 }
0x28e3   :  { %v1877_v13 = vpop.permute.xlu0 %1876 }
0x28e4   :  { %v1879_v63 = vmul.f32 %v2675_v57, %v1877_v13 }
0x28e6   :  { %1881 = vrot.lane.b32.xlu1 %v1879_v63, %s2715_s5 }
0x2958   :  { %v1882_v0 = vpop.permute.xlu1 %1881 }
0x2959   :  { %1884 = vst.msk [vmem:[#allocation3 + $0xc] sm:$0x3] %vm343_vm4, %v1882_v0  ;;  %2425 = vmatmul.mubr.msk.f32.vlgmr.msra.gmra.mrb[18].mxu1 %vm240_vm5, %v1882_v0 }
0x2a2c   :  { %v1954_v2 = vpop.f32.mrb[18].mxu1 }
0x2a2d   :  { %v1958_v3 = vadd.f32 %v1954_v2, %v1885_v1  ;;  %v2426_v4 = vpop.f32.mrb[19].mxu1 }
0x2a2f   :  { %2678 = vtanh.f32 %v1958_v3  ;;  %v2128_v6 = vmul.f32 -1.442695, %v1958_v3 }
0x2a31   :  { %2680 = vpow2.f32 %v2128_v6 }
0x2a39   :  { %v2679_v5 = vpop.eup %2678 }
0x2a3a   :  { %1968 = vrot.lane.b32.xlu0 %v2679_v5, %s2714_s27 }
0x2a3b   :  { %v2681_v7 = vpop.eup %2680 }
0x2a3c   :  { %v1962_v9 = vadd.f32 1.0, %v2681_v7 }
0x2a3e   :  { %2682 = vrcp.f32 %v1962_v9 }
0x2a48   :  { %v2683_v10 = vpop.eup %2682 }
0x2a49   :  { %v1966_v16 = vmul.f32 %v2683_v10, %v1873_v61 }
0x2aac   :  { %v1969_v14 = vpop.permute.xlu0 %1968 }
0x2aad   :  { %v1971_v15 = vmul.f32 %v2683_v10, %v1969_v14 }
0x2aaf   :  { %1973 = vrot.lane.b32.xlu1 %v1971_v15, %s2715_s5 }
0x2b21   :  { %v1974_v17 = vpop.permute.xlu1 %1973 }
0x2b22   :  { %v1976_v18 = vadd.f32 %v1974_v17, %v1966_v16 }
0x2b24   :  { %2684 = vtanh.f32 %v1976_v18 }
0x2b2e   :  { %v2685_v19 = vpop.eup %2684 }
0x2b2f   :  { %1979 = vrot.lane.b32.xlu0 %v2685_v19, %s2714_s27 }
0x2ba1   :  { %v1980_v26 = vpop.permute.xlu0 %1979 }
0x2ba2   :  { %v1982_v27 = vmul.f32 %v2683_v10, %v1980_v26 }
0x2ba4   :  { %1984 = vrot.lane.b32.xlu1 %v1982_v27, %s2715_s5 }
0x2c16   :  { %v1985_v28 = vpop.permute.xlu1 %1984 }
0x2c17   :  { %1987 = vst.msk [vmem:[#allocation3 + $0xe] sm:$0x3] %vm343_vm4, %v1985_v28 }
0x2c1e   :  { %v1989_v29 = vld [vmem:[#allocation3 + $0x8] sm:$0xff] }
0x2c1f   :  { %2436 = vmatmul.mubr.msk.f32.vlgmr.msra.gmra.mrb[18].mxu0 %vm240_vm5, %v1989_v29 }
0x2cf2   :  { %v2437_v31 = vpop.f32.mrb[18].mxu0 }
0x2cf3   :  { %v2079_v32 = vadd.f32 %v2437_v31, %v2129_v30  ;;  %v2073_v33 = vpop.f32.mrb[19].mxu0 }
0x2cf4   :  { %v2074_v34 = vadd.f32 %v2129_v30, %v2073_v33 }
0x2cf5   :  { %2084 = vst.msk [vmem:[%s3085_s11 + $0x8] sm:$0xff] %vm2082_vm6, %v2079_v32 }
0x2cf6   :  { %2083 = vst.msk [vmem:[%s3085_s11] sm:$0xff] %vm2082_vm6, %v2074_v34 }
0x2cf7   :  { %2089 = vsyncpa [#allocation5], 1 }

</bundles_post_ra>
